<compile_context>
chip_gen: v5e
topology: v5e:2x2
jax: 0.10.0
libtpu: 0.0.40
codegen_flags: <defaults>
</compile_context>

<pallas_src>
import functools

import jax
import jax.numpy as jnp
from jax import lax
from jax.experimental import pallas as pl
from jax.experimental.pallas import tpu as pltpu


LANE = 128
ROW_TILE = 512


def _round_up(x, m):
    return ((x + m - 1) // m) * m


def _pick_rows(P, row_tile=ROW_TILE):
    """Row-tile size and padded row count (tile multiple, sublane aligned)."""
    tp = row_tile if P >= row_tile else _round_up(P, 8)
    return tp, _round_up(P, tp)


# ----------------------------------------------------------------------------
# Kernel 1: fused matmul (+bias, +optional SiLU) over flattened pixels.
# ----------------------------------------------------------------------------

def _mm_kernel(x_ref, w_ref, b_ref, o_ref, *, act):
    x = x_ref[...].astype(jnp.bfloat16)              # bf16 into the MXU
    y = jnp.dot(x, w_ref[...], preferred_element_type=jnp.float32) + b_ref[...]
    if act:
        y = y * jax.nn.sigmoid(y)                    # SiLU
    o_ref[...] = y.astype(o_ref.dtype)


def fused_matmul(x2d, w, b, *, act):
    """y = x2d @ w + b (optionally SiLU).  x2d: (P,K) f32, w: (K,N), b: (N,).

    Cout is padded to a multiple of 128 (lane-dense stores), rows are padded to
    a multiple of the row tile; padding is sliced off before returning.
    """
    P, K = x2d.shape
    N = w.shape[1]
    Np = _round_up(N, LANE)
    wp = jnp.pad(w, ((0, 0), (0, Np - N))).astype(jnp.bfloat16)
    bp = jnp.pad(b, ((0, Np - N),)).reshape(1, Np).astype(jnp.float32)

    tp, Pp = _pick_rows(P)
    xf = x2d if Pp == P else jnp.pad(x2d, ((0, Pp - P), (0, 0)))

    out = pl.pallas_call(
        functools.partial(_mm_kernel, act=act),
        out_shape=jax.ShapeDtypeStruct((Pp, Np), jnp.float32),
        grid=(Pp // tp,),
        in_specs=[
            pl.BlockSpec((tp, K), lambda i: (i, 0)),
            pl.BlockSpec((K, Np), lambda i: (0, 0)),
            pl.BlockSpec((1, Np), lambda i: (0, 0)),
        ],
        out_specs=pl.BlockSpec((tp, Np), lambda i: (i, 0)),
        compiler_params=pltpu.CompilerParams(dimension_semantics=("parallel",)),
    )(xf, wp, bp)
    return out[:P, :N]


def conv1x1(x_nhwc, w, b, *, act):
    B, H, W, Cin = x_nhwc.shape
    y = fused_matmul(x_nhwc.reshape(B * H * W, Cin), w, b, act=act)
    return y.reshape(B, H, W, w.shape[1])


def _im2col_3x3(x_nhwc):
    """(B,H,W,C) -> (B*H*W, 9*C) slab for a stride-1 / pad-1 3x3 conv."""
    B, H, W, C = x_nhwc.shape
    xp = jnp.pad(x_nhwc, ((0, 0), (1, 1), (1, 1), (0, 0)))
    cols = [xp[:, dy:dy + H, dx:dx + W, :] for dy in range(3) for dx in range(3)]
    return jnp.concatenate(cols, axis=-1).reshape(B * H * W, 9 * C)
    # TODO(synk): at real YOLOv5 feature-map sizes, fold pad+im2col into the
    # kernel with a row-halo BlockSpec instead of materializing the 9x slab.


def conv3x3(x_nhwc, w9, b, *, act):
    """3x3 conv, stride 1, pad 1.  w9: (9*Cin, Cout), rows tap-major (k*Cin+c)."""
    B, H, W, _ = x_nhwc.shape
    y = fused_matmul(_im2col_3x3(x_nhwc), w9, b, act=act)
    return y.reshape(B, H, W, w9.shape[1])


# ----------------------------------------------------------------------------
# Kernel 2: fused detect head = 1x1 conv (+bias) + sigmoid + grid/anchor decode.
# Outputs both the raw logits (returned as x[i]) and the decoded boxes (z).
# ----------------------------------------------------------------------------

def _head_decode_kernel(x_ref, w_ref, b_ref, mode_ref, anch_ref,
                        raw_ref, dec_ref, *, stride, hw, width, tp):
    x = x_ref[...].astype(jnp.bfloat16)
    y = jnp.dot(x, w_ref[...], preferred_element_type=jnp.float32) + b_ref[...]
    s = jax.nn.sigmoid(y)

    # per-row pixel coordinates (rows are row-major over B,H,W)
    rows = pl.program_id(0) * tp + lax.broadcasted_iota(jnp.int32, (tp, 1), 0)
    pix = rows % hw
    gy = (pix // width).astype(jnp.float32) - 0.5
    gx = (pix % width).astype(jnp.float32) - 0.5

    # per-column mode: 0 -> x, 1 -> y, 2 -> wh, 3 -> sigmoid(conf/cls), 4 -> mask
    mode = mode_ref[...]                              # (1, Np) int32
    isx = (mode == 0).astype(jnp.float32)
    isy = (mode == 1).astype(jnp.float32)
    grid_add = gx * isx + gy * isy                    # (tp, Np)

    xy_val = (s * 2.0 + grid_add) * stride
    wh_val = (s * 2.0) ** 2 * anch_ref[...]
    dec = jnp.where(mode < 2, xy_val,
          jnp.where(mode == 2, wh_val,
          jnp.where(mode == 3, s, y)))                # mask channels stay raw

    raw_ref[...] = y
    dec_ref[...] = dec


def head_conv_decode(x_nhwc, w, b, anchors_i, stride, nc, no, na):
    """Fused Detect head for one level.

    Returns (raw, dec), each shaped (B, na, H, W, no) in torch channel order.
    """
    B, H, W, Cin = x_nhwc.shape
    Cout = na * no
    Np = _round_up(Cout, LANE)
    P = B * H * W
    tp, Pp = _pick_rows(P)

    wp = jnp.pad(w, ((0, 0), (0, Np - Cout))).astype(jnp.bfloat16)
    bp = jnp.pad(b, ((0, Np - Cout),)).reshape(1, Np).astype(jnp.float32)

    # tiny (1, Np) per-column constants (NOT (P, no) zero-padded tensors)
    cols = jnp.arange(Np)
    j_idx = cols % no
    mode = jnp.where(j_idx < 2, j_idx,
           jnp.where(j_idx < 4, 2,
           jnp.where(j_idx < 5 + nc, 3, 4)))
    mode = jnp.where(cols < Cout, mode, 4).astype(jnp.int32).reshape(1, Np)

    a_idx = jnp.clip(cols // no, 0, na - 1)
    anch = (anchors_i * stride)[a_idx, jnp.clip(j_idx - 2, 0, 1)]
    anch = jnp.where((j_idx >= 2) & (j_idx < 4) & (cols < Cout), anch, 0.0)
    anch = anch.reshape(1, Np).astype(jnp.float32)

    xf = x_nhwc.reshape(P, Cin)
    if Pp != P:
        xf = jnp.pad(xf, ((0, Pp - P), (0, 0)))

    raw, dec = pl.pallas_call(
        functools.partial(_head_decode_kernel, stride=float(stride),
                          hw=H * W, width=W, tp=tp),
        out_shape=(jax.ShapeDtypeStruct((Pp, Np), jnp.float32),
                   jax.ShapeDtypeStruct((Pp, Np), jnp.float32)),
        grid=(Pp // tp,),
        in_specs=[
            pl.BlockSpec((tp, Cin), lambda i: (i, 0)),
            pl.BlockSpec((Cin, Np), lambda i: (0, 0)),
            pl.BlockSpec((1, Np), lambda i: (0, 0)),
            pl.BlockSpec((1, Np), lambda i: (0, 0)),
            pl.BlockSpec((1, Np), lambda i: (0, 0)),
        ],
        out_specs=(pl.BlockSpec((tp, Np), lambda i: (i, 0)),
                   pl.BlockSpec((tp, Np), lambda i: (i, 0))),
        compiler_params=pltpu.CompilerParams(dimension_semantics=("parallel",)),
    )(xf, wp, bp, mode, anch)

    def to5(t):  # (P, Np) -> (B, na, H, W, no), matching torch view/permute
        t = t[:P, :Cout].reshape(B, H, W, na, no)
        return jnp.transpose(t, (0, 3, 1, 2, 4))

    return to5(raw), to5(dec)


# ----------------------------------------------------------------------------
# Module glue: Proto branch, Segment forward, parameter init
# ----------------------------------------------------------------------------

def _upsample2x_nearest(x_nhwc):
    # layout-only op (nearest-neighbor 2x) left to XLA in the wrapper
    return jnp.repeat(jnp.repeat(x_nhwc, 2, axis=1), 2, axis=2)


def proto_forward(x_nhwc, pp):
    y = conv3x3(x_nhwc, pp['cv1_w'], pp['cv1_b'], act=True)
    y = _upsample2x_nearest(y)
    y = conv3x3(y, pp['cv2_w'], pp['cv2_b'], act=True)
    y = conv1x1(y, pp['cv3_w'], pp['cv3_b'], act=True)
    return y


def segment_forward(xs_nchw, params, anchors, strides, nc, nm, na):
    """Eval-mode (not training / not export) Segment forward.

    Returns (cat(z, 1), proto_masks_NCHW, x_list) matching the torch module.
    """
    no = 5 + nc + nm

    # mask prototypes from the highest-resolution level
    x0 = jnp.transpose(xs_nchw[0], (0, 2, 3, 1))              # NCHW -> NHWC
    p = jnp.transpose(proto_forward(x0, params['proto']), (0, 3, 1, 2))

    z, x_out = [], []
    for i, x_nchw in enumerate(xs_nchw):
        hp = params['head'][i]
        x = jnp.transpose(x_nchw, (0, 2, 3, 1))               # NCHW -> NHWC
        raw5, dec5 = head_conv_decode(x, hp['w'], hp['b'],
                                      anchors[i], strides[i], nc, no, na)
        x_out.append(raw5)                                    # (B,na,ny,nx,no)
        z.append(dec5.reshape(dec5.shape[0], -1, no))
    return jnp.concatenate(z, axis=1), p, x_out


def init_conv_bn(key, cin, cout, k):
    """yolov5 Conv = Conv2d(bias=False)+BN+SiLU; fold eval-mode BN into (w,b)."""
    kw, kg, kb, km, kv = jax.random.split(key, 5)
    w = 0.05 * jax.random.normal(kw, (k * k * cin, cout), jnp.float32)
    gamma = 1.0 + 0.1 * jax.random.normal(kg, (cout,), jnp.float32)
    beta = 0.1 * jax.random.normal(kb, (cout,), jnp.float32)
    mean = 0.1 * jax.random.normal(km, (cout,), jnp.float32)
    var = 0.5 + 0.5 * jnp.abs(jax.random.normal(kv, (cout,), jnp.float32))
    scale = gamma / jnp.sqrt(var + 1e-5)
    return w * scale[None, :], beta - mean * scale


def init_conv_bias(key, cin, cout):
    kw, kb = jax.random.split(key)
    w = 0.05 * jax.random.normal(kw, (cin, cout), jnp.float32)
    b = 0.1 * jax.random.normal(kb, (cout,), jnp.float32)
    return w, b


def init_params(key, ch, nc, nm, npr, na):
    no = 5 + nc + nm
    kp, kh = jax.random.split(key)
    kp1, kp2, kp3 = jax.random.split(kp, 3)
    proto = {}
    proto['cv1_w'], proto['cv1_b'] = init_conv_bn(kp1, ch[0], npr, 3)
    proto['cv2_w'], proto['cv2_b'] = init_conv_bn(kp2, npr, npr, 3)
    proto['cv3_w'], proto['cv3_b'] = init_conv_bn(kp3, npr, nm, 1)
    head = []
    for i, c in enumerate(ch):
        w, b = init_conv_bias(jax.random.fold_in(kh, i), c, na * no)
        head.append(dict(w=w, b=b))
    return dict(proto=proto, head=head)


# ----------------------------------------------------------------------------
# Pure-JAX reference (same math, same bf16 rounding of matmul operands)
# ----------------------------------------------------------------------------

def _ref_mm(x2d, w, b, act):
    y = jnp.dot(x2d.astype(jnp.bfloat16), w.astype(jnp.bfloat16),
                preferred_element_type=jnp.float32) + b
    return y * jax.nn.sigmoid(y) if act else y


def _ref_c1(x, w, b, act):
    B, H, W, C = x.shape
    return _ref_mm(x.reshape(-1, C), w, b, act).reshape(B, H, W, -1)


def _ref_c3(x, w9, b, act):
    B, H, W, _ = x.shape
    return _ref_mm(_im2col_3x3(x), w9, b, act).reshape(B, H, W, -1)


def ref_segment_forward(xs_nchw, params, anchors, strides, nc, nm, na):
    no = 5 + nc + nm
    pr = params['proto']
    p = _ref_c3(jnp.transpose(xs_nchw[0], (0, 2, 3, 1)), pr['cv1_w'], pr['cv1_b'], True)
    p = jnp.repeat(jnp.repeat(p, 2, axis=1), 2, axis=2)
    p = _ref_c3(p, pr['cv2_w'], pr['cv2_b'], True)
    p = _ref_c1(p, pr['cv3_w'], pr['cv3_b'], True)
    p = jnp.transpose(p, (0, 3, 1, 2))

    z, x_out = [], []
    for i, x_nchw in enumerate(xs_nchw):
        hp = params['head'][i]
        x = jnp.transpose(x_nchw, (0, 2, 3, 1))
        B, H, W, _ = x.shape
        y = _ref_c1(x, hp['w'], hp['b'], False)                       # (B,H,W,na*no)
        y5 = jnp.transpose(y.reshape(B, H, W, na, no), (0, 3, 1, 2, 4))
        x_out.append(y5)
        yy = jnp.arange(H, dtype=jnp.float32)
        xx = jnp.arange(W, dtype=jnp.float32)
        yv, xv = jnp.meshgrid(yy, xx, indexing='ij')
        grid = jnp.stack((xv, yv), 2)[None, None] - 0.5               # (1,1,H,W,2)
        ag = (anchors[i] * strides[i]).reshape(1, na, 1, 1, 2)
        xy = (jax.nn.sigmoid(y5[..., :2]) * 2.0 + grid) * strides[i]
        wh = (jax.nn.sigmoid(y5[..., 2:4]) * 2.0) ** 2 * ag
        conf = jax.nn.sigmoid(y5[..., 4:5 + nc])
        mask = y5[..., 5 + nc:]
        z.append(jnp.concatenate([xy, wh, conf, mask], -1).reshape(B, -1, no))
    return jnp.concatenate(z, axis=1), p, x_out


# ----------------------------------------------------------------------------
# Main
# ----------------------------------------------------------------------------

if __name__ == "__main__":
    key = jax.random.PRNGKey(0)

    nc, nm, npr = 7, 8, 32            # small synthetic Segment config
    anchors = jnp.array([[10., 13., 16., 30., 33., 23.],
                         [30., 61., 62., 45., 59., 119.]], jnp.float32)
    nl = anchors.shape[0]
    na = anchors.shape[1] // 2
    anchors = anchors.reshape(nl, na, 2)
    strides = (8.0, 16.0)
    ch = (16, 32)
    no = 5 + nc + nm

    # inputs in PyTorch NCHW layout
    in_shapes = [(2, ch[0], 16, 16), (2, ch[1], 8, 8)]
    keys = jax.random.split(key, nl + 1)
    xs = [jax.random.normal(keys[i], s, jnp.float32) for i, s in enumerate(in_shapes)]
    params = init_params(keys[-1], ch, nc, nm, npr, na)

    # Pallas path
    z, p, x_out = segment_forward(xs, params, anchors, strides, nc, nm, na)
    z = jax.block_until_ready(z)
    p = jax.block_until_ready(p)
    x_out = [jax.block_until_ready(t) for t in x_out]

    # Pure-JAX reference cross-check
    z_ref, p_ref, x_ref = ref_segment_forward(xs, params, anchors, strides, nc, nm, na)

    total = na * (16 * 16 + 8 * 8)
    assert z.shape == (2, total, no), z.shape
    assert p.shape == (2, nm, 32, 32), p.shape
    assert x_out[0].shape == (2, na, 16, 16, no)
    assert x_out[1].shape == (2, na, 8, 8, no)
    assert bool(jnp.all(jnp.isfinite(z))) and bool(jnp.all(jnp.isfinite(p)))
    assert jnp.allclose(z, z_ref, atol=2e-2, rtol=2e-2), float(jnp.max(jnp.abs(z - z_ref)))
    assert jnp.allclose(p, p_ref, atol=2e-2, rtol=2e-2)
    for a, b in zip(x_out, x_ref):
        assert jnp.allclose(a, b, atol=2e-2, rtol=2e-2)

    print("KERNEL_OK")
</pallas_src>

<mosaic_0001>
module attributes {stable_mosaic.version = 11 : i64} {
  func.func @_mm_kernel(%arg0: i32, %arg1: memref<512x144xf32, #tpu.memory_space<vmem>>, %arg2: memref<144x128xbf16, #tpu.memory_space<vmem>>, %arg3: memref<1x128xf32, #tpu.memory_space<vmem>>, %arg4: memref<512x128xf32, #tpu.memory_space<vmem>>) attributes {dimension_semantics = [#tpu.dimension_semantics<parallel>], iteration_bounds = array<i64: 1>, scalar_prefetch = 0 : i64, scratch_operands = 0 : i64, tpu.core_type = #tpu.core_type<tc>, window_params = [{transform_indices = @transform_0, window_bounds = array<i64: 512, 144>}, {pipeline_mode = #tpu.pipeline_mode<synchronous>, transform_indices = @transform_1, window_bounds = array<i64: 144, 128>}, {pipeline_mode = #tpu.pipeline_mode<synchronous>, transform_indices = @transform_2, window_bounds = array<i64: 1, 128>}, {transform_indices = @transform_3, window_bounds = array<i64: 512, 128>}]} {
    %c0 = arith.constant 0 : index
    %c0_0 = arith.constant 0 : index
    %0 = vector.load %arg1[%c0, %c0_0] : memref<512x144xf32, #tpu.memory_space<vmem>>, vector<512x144xf32>
    %1 = arith.truncf %0 : vector<512x144xf32> to vector<512x144xbf16>
    %c0_1 = arith.constant 0 : index
    %c0_2 = arith.constant 0 : index
    %2 = vector.load %arg2[%c0_1, %c0_2] : memref<144x128xbf16, #tpu.memory_space<vmem>>, vector<144x128xbf16>
    %cst = arith.constant dense<0.000000e+00> : vector<512x128xf32>
    %3 = tpu.matmul %1, %2, %cst {dimension_numbers = #tpu.dot_dimension_numbers<[1], [0], [0], [1], [0, 0, 1, 1], [], []>} : vector<512x144xbf16>, vector<144x128xbf16>, vector<512x128xf32> -> vector<512x128xf32>
    %c0_3 = arith.constant 0 : index
    %c0_4 = arith.constant 0 : index
    %4 = vector.load %arg3[%c0_3, %c0_4] : memref<1x128xf32, #tpu.memory_space<vmem>>, vector<1x128xf32>
    %5 = vector.broadcast %4 : vector<1x128xf32> to vector<512x128xf32>
    %6 = arith.addf %3, %5 : vector<512x128xf32>
    %7 = arith.negf %6 : vector<512x128xf32>
    %8 = math.exp %7 : vector<512x128xf32>
    %cst_5 = arith.constant 1.000000e+00 : f32
    %9 = vector.broadcast %cst_5 : f32 to vector<512x128xf32>
    %10 = arith.addf %9, %8 : vector<512x128xf32>
    %11 = arith.divf %9, %10 : vector<512x128xf32>
    %12 = arith.mulf %6, %11 : vector<512x128xf32>
    %c0_6 = arith.constant 0 : index
    %c0_7 = arith.constant 0 : index
    %13 = vector.load %arg4[%c0_6, %c0_7] : memref<512x128xf32, #tpu.memory_space<vmem>>, vector<512x128xf32>
    tpu.vector_store %arg4[%c0_6, %c0_7], %12 {strides = array<i32>} : memref<512x128xf32, #tpu.memory_space<vmem>>, vector<512x128xf32>,
    return
  }
  func.func @transform_0(%arg0: i32) -> (i32, i32) {
    %c0_i32 = arith.constant 0 : i32
    %c0_i32_0 = arith.constant 0 : i32
    return %arg0, %c0_i32 : i32, i32
  }
  func.func @transform_1(%arg0: i32) -> (i32, i32) {
    %c0_i32 = arith.constant 0 : i32
    %c0_i32_0 = arith.constant 0 : i32
    %c0_i32_1 = arith.constant 0 : i32
    return %c0_i32, %c0_i32_0 : i32, i32
  }
  func.func @transform_2(%arg0: i32) -> (i32, i32) {
    %c0_i32 = arith.constant 0 : i32
    %c0_i32_0 = arith.constant 0 : i32
    %c0_i32_1 = arith.constant 0 : i32
    return %c0_i32, %c0_i32_0 : i32, i32
  }
  func.func @transform_3(%arg0: i32) -> (i32, i32) {
    %c0_i32 = arith.constant 0 : i32
    %c0_i32_0 = arith.constant 0 : i32
    return %arg0, %c0_i32 : i32, i32
  }
}

</mosaic_0001>

<bundles_post_ra>
// kernel: tpu_custom_call.1
= control target key start
LH: loop header
LB: loop body
LE: loop exit
PB: predicated region body
PF: predicated region fallthrough
CT: control target
= control target key end

     0   :  { %vm284_vm0 = vcmask 130048   ;;  %s4566_s0 = inlined_call_operand.vmem [shape: f32[512,144], index: 0, kind: input, shape index: {}]   ;;  %s4567_s1 = inlined_call_operand.vmem [shape: bf16[144,128], index: 1, kind: input, shape index: {}]   ;;  %s4568_s2 = inlined_call_operand.vmem [shape: f32[1,128], index: 2, kind: input, shape index: {}]   ;;  %s4569_s3 = inlined_call_operand.hbm [shape: f32[512,128], index: 3, kind: output, shape index: {}]  }
   0x1   :  { %v2220_v0 = vld [vmem:[%s4567_s1 + $0x38] sm:$0xff]  ;;  %v2221_v1 = vld [vmem:[%s4567_s1 + $0x40] sm:$0xff]  ;;  %v17_v2 = vld [vmem:[%s4566_s0 + $0x8] sm:$0xff] }
   0x2   :  { %v19_v3 = vld [vmem:[%s4566_s0 + $0x18] sm:$0xff]  ;;  %381 = vmatpush.bf16.msra.mxu0 %v2220_v0  ;;  %2222 = vmatpush.bf16.msra.mxu2 %v2220_v0  ;;  %v2219_v5 = vld [vmem:[%s4567_s1 + $0x30] sm:$0xff]  ;;  %v2218_v6 = vld [vmem:[%s4567_s1 + $0x28] sm:$0xff] }
   0x3   :  { %v145_v4 = vpack.c.bf16 %v19_v3, %v17_v2  ;;  %557 = vmatpush.bf16.msra.mxu1 %v2221_v1  ;;  %2230 = vmatpush.bf16.msra.mxu3 %v2221_v1  ;;  %v85_v7 = vld [vmem:[%s4566_s0 + $0x228] sm:$0xff]  ;;  %v87_v8 = vld [vmem:[%s4566_s0 + $0x238] sm:$0xff] }
   0x4   :  { %v179_v9 = vpack.c.bf16 %v87_v8, %v85_v7 }
   0x6   :  { %2117 = vmatmul.msk.bf16.vlgmr.msra.gmra.mxu1 %vm284_vm0, %v145_v4  ;;  %382 = vmatpush.bf16.msra.mxu0 %v2219_v5 }
   0x7   :  { %2223 = vmatpush.bf16.msra.mxu2 %v2219_v5 }
   0x8   :  { %8 = vsyncpa [#allocation3], 0  ;;  %2134 = vmatmul.msk.bf16.vlgmr.msra.gmra.mxu3 %vm284_vm0, %v179_v9  ;;  %v2217_v10 = vld [vmem:[%s4567_s1 + $0x20] sm:$0xff]  ;;  %v2216_v11 = vld [vmem:[%s4567_s1 + $0x18] sm:$0xff]  ;;  %s2069_s17 = sshll.u32 %s4569_s3, 4  ;;  %s2521_s18 = smov 128   ;;  %s2070_s17 = int_to_ptr.hbm [resolvable:$true] %s2069_s17 }
   0x9   :  { %v21_v12 = vld [vmem:[%s4566_s0 + $0x28] sm:$0xff]  ;;  %v23_v13 = vld [vmem:[%s4566_s0 + $0x38] sm:$0xff]  ;;  %v2215_v15 = vld [vmem:[%s4567_s1 + $0x10] sm:$0xff]  ;;  %s2522_s19 = smov 8  }
   0xa   :  { %383 = vmatpush.bf16.msra.mxu0 %v2218_v6  ;;  %v147_v14 = vpack.c.bf16 %v23_v13, %v21_v12  ;;  %v2214_v16 = vld [vmem:[%s4567_s1 + $0x8] sm:$0xff]  ;;  %v91_v18 = vld [vmem:[%s4566_s0 + $0x258] sm:$0xff]  ;;  %v2213_v20 = vld [vmem:[%s4567_s1] sm:$0xff] }
   0xb   :  { %2224 = vmatpush.bf16.msra.mxu2 %v2218_v6  ;;  %v89_v17 = vld [vmem:[%s4566_s0 + $0x248] sm:$0xff]  ;;  %v16_v21 = vld [vmem:[%s4566_s0] sm:$0xff]  ;;  %v18_v22 = vld [vmem:[%s4566_s0 + $0x10] sm:$0xff] }
   0xc   :  { %v181_v19 = vpack.c.bf16 %v91_v18, %v89_v17  ;;  %v80_v23 = vld [vmem:[%s4566_s0 + $0x200] sm:$0xff]  ;;  %v82_v24 = vld [vmem:[%s4566_s0 + $0x210] sm:$0xff]  ;;  %v144_v25 = vpack.c.bf16 %v18_v22, %v16_v21  ;;  %v25_v27 = vld [vmem:[%s4566_s0 + $0x48] sm:$0xff] }
   0xd   :  { %v176_v26 = vpack.c.bf16 %v82_v24, %v80_v23  ;;  %v27_v28 = vld [vmem:[%s4566_s0 + $0x58] sm:$0xff]  ;;  %v93_v30 = vld [vmem:[%s4566_s0 + $0x268] sm:$0xff]  ;;  %v20_v33 = vld [vmem:[%s4566_s0 + $0x20] sm:$0xff] }
   0xe   :  { %384 = vmatpush.bf16.msra.mxu0 %v2217_v10  ;;  %v149_v29 = vpack.c.bf16 %v27_v28, %v25_v27  ;;  %v95_v31 = vld [vmem:[%s4566_s0 + $0x278] sm:$0xff]  ;;  %v22_v34 = vld [vmem:[%s4566_s0 + $0x30] sm:$0xff]  ;;  %v84_v35 = vld [vmem:[%s4566_s0 + $0x220] sm:$0xff] }
   0xf   :  { %2225 = vmatpush.bf16.msra.mxu2 %v2217_v10  ;;  %v183_v32 = vpack.c.bf16 %v95_v31, %v93_v30  ;;  %v86_v36 = vld [vmem:[%s4566_s0 + $0x230] sm:$0xff]  ;;  %v146_v37 = vpack.c.bf16 %v22_v34, %v20_v33  ;;  %v29_v39 = vld [vmem:[%s4566_s0 + $0x68] sm:$0xff]  ;;  %v31_v40 = vld [vmem:[%s4566_s0 + $0x78] sm:$0xff] }
  0x10   :  { %v178_v38 = vpack.c.bf16 %v86_v36, %v84_v35  ;;  %v151_v41 = vpack.c.bf16 %v31_v40, %v29_v39  ;;  %v97_v42 = vld [vmem:[%s4566_s0 + $0x288] sm:$0xff]  ;;  %v99_v43 = vld [vmem:[%s4566_s0 + $0x298] sm:$0xff]  ;;  %v24_v45 = vld [vmem:[%s4566_s0 + $0x40] sm:$0xff] }
  0x11   :  { %v185_v44 = vpack.c.bf16 %v99_v43, %v97_v42  ;;  %v26_v46 = vld [vmem:[%s4566_s0 + $0x50] sm:$0xff]  ;;  %v88_v47 = vld [vmem:[%s4566_s0 + $0x240] sm:$0xff]  ;;  %v33_v51 = vld [vmem:[%s4566_s0 + $0x88] sm:$0xff] }
  0x12   :  { %385 = vmatpush.bf16.msra.mxu0 %v2216_v11  ;;  %v90_v48 = vld [vmem:[%s4566_s0 + $0x250] sm:$0xff]  ;;  %v148_v49 = vpack.c.bf16 %v26_v46, %v24_v45  ;;  %v35_v52 = vld [vmem:[%s4566_s0 + $0x98] sm:$0xff]  ;;  %v101_v54 = vld [vmem:[%s4566_s0 + $0x2a8] sm:$0xff] }
  0x13   :  { %2226 = vmatpush.bf16.msra.mxu2 %v2216_v11  ;;  %v180_v50 = vpack.c.bf16 %v90_v48, %v88_v47  ;;  %v153_v53 = vpack.c.bf16 %v35_v52, %v33_v51  ;;  %v103_v55 = vld [vmem:[%s4566_s0 + $0x2b8] sm:$0xff]  ;;  %v28_v57 = vld [vmem:[%s4566_s0 + $0x60] sm:$0xff]  ;;  %v30_v58 = vld [vmem:[%s4566_s0 + $0x70] sm:$0xff] }
  0x14   :  { %v187_v56 = vpack.c.bf16 %v103_v55, %v101_v54  ;;  %v92_v59 = vld [vmem:[%s4566_s0 + $0x260] sm:$0xff]  ;;  %v94_v60 = vld [vmem:[%s4566_s0 + $0x270] sm:$0xff]  ;;  %v150_v61 = vpack.c.bf16 %v30_v58, %v28_v57  ;;  %v37_v63 = vld [vmem:[%s4566_s0 + $0xa8] sm:$0xff] }
  0x15   :  { %v182_v62 = vpack.c.bf16 %v94_v60, %v92_v59  ;;  %v39_v0 = vld [vmem:[%s4566_s0 + $0xb8] sm:$0xff]  ;;  %v105_v2 = vld [vmem:[%s4566_s0 + $0x2c8] sm:$0xff]  ;;  %v32_v5 = vld [vmem:[%s4566_s0 + $0x80] sm:$0xff] }
  0x16   :  { %2118 = vmatmul.msk.bf16.gmra.mxu1 %vm284_vm0, %v147_v14  ;;  %386 = vmatpush.bf16.msra.mxu0 %v2215_v15  ;;  %v155_v1 = vpack.c.bf16 %v39_v0, %v37_v63  ;;  %v107_v3 = vld [vmem:[%s4566_s0 + $0x2d8] sm:$0xff]  ;;  %v34_v6 = vld [vmem:[%s4566_s0 + $0x90] sm:$0xff]  ;;  %v96_v7 = vld [vmem:[%s4566_s0 + $0x280] sm:$0xff] }
  0x17   :  { %2227 = vmatpush.bf16.msra.mxu2 %v2215_v15  ;;  %v189_v4 = vpack.c.bf16 %v107_v3, %v105_v2  ;;  %v98_v8 = vld [vmem:[%s4566_s0 + $0x290] sm:$0xff]  ;;  %v152_v9 = vpack.c.bf16 %v34_v6, %v32_v5  ;;  %v41_v11 = vld [vmem:[%s4566_s0 + $0xc8] sm:$0xff]  ;;  %v43_v12 = vld [vmem:[%s4566_s0 + $0xd8] sm:$0xff] }
  0x18   :  { %2135 = vmatmul.msk.bf16.gmra.mxu3 %vm284_vm0, %v181_v19  ;;  %v184_v10 = vpack.c.bf16 %v98_v8, %v96_v7  ;;  %v157_v13 = vpack.c.bf16 %v43_v12, %v41_v11  ;;  %v109_v14 = vld [vmem:[%s4566_s0 + $0x2e8] sm:$0xff]  ;;  %v111_v15 = vld [vmem:[%s4566_s0 + $0x2f8] sm:$0xff]  ;;  %v38_v17 = vld [vmem:[%s4566_s0 + $0xb0] sm:$0xff] }
  0x19   :  { %v191_v18 = vpack.c.bf16 %v111_v15, %v109_v14  ;;  %v100_v19 = vld [vmem:[%s4566_s0 + $0x2a0] sm:$0xff]  ;;  %v45_v23 = vld [vmem:[%s4566_s0 + $0xe8] sm:$0xff]  ;;  %v47_v24 = vld [vmem:[%s4566_s0 + $0xf8] sm:$0xff] }
  0x1a   :  { %387 = vmatpush.bf16.msra.mxu0 %v2214_v16  ;;  %v115_v27 = vld [vmem:[%s4566_s0 + $0x318] sm:$0xff]  ;;  %v40_v28 = vld [vmem:[%s4566_s0 + $0xc0] sm:$0xff]  ;;  %v49_v35 = vld [vmem:[%s4566_s0 + $0x108] sm:$0xff] }
  0x1b   :  { %2228 = vmatpush.bf16.msra.mxu2 %v2214_v16  ;;  %v36_v16 = vld [vmem:[%s4566_s0 + $0xa0] sm:$0xff]  ;;  %v51_v36 = vld [vmem:[%s4566_s0 + $0x118] sm:$0xff]  ;;  %v117_v39 = vld [vmem:[%s4566_s0 + $0x328] sm:$0xff] }
  0x1c   :  { %v154_v21 = vpack.c.bf16 %v38_v17, %v36_v16  ;;  %v104_v31 = vld [vmem:[%s4566_s0 + $0x2c0] sm:$0xff]  ;;  %v119_v40 = vld [vmem:[%s4566_s0 + $0x338] sm:$0xff]  ;;  %v46_v42 = vld [vmem:[%s4566_s0 + $0xf0] sm:$0xff] }
  0x1d   :  { %v195_v43 = vpack.c.bf16 %v119_v40, %v117_v39  ;;  %v108_v45 = vld [vmem:[%s4566_s0 + $0x2e0] sm:$0xff]  ;;  %v110_v46 = vld [vmem:[%s4566_s0 + $0x2f0] sm:$0xff]  ;;  %v121_v59 = vld [vmem:[%s4566_s0 + $0x348] sm:$0xff] }
  0x1e   :  { %388 = vmatpush.bf16.msra.mxu0 %v2213_v20  ;;  %v190_v48 = vpack.c.bf16 %v110_v46, %v108_v45  ;;  %v50_v54 = vld [vmem:[%s4566_s0 + $0x110] sm:$0xff]  ;;  %v112_v57 = vld [vmem:[%s4566_s0 + $0x300] sm:$0xff]  ;;  %v123_v60 = vld [vmem:[%s4566_s0 + $0x358] sm:$0xff] }
  0x1f   :  { %2229 = vmatpush.bf16.msra.mxu2 %v2213_v20  ;;  %v102_v20 = vld [vmem:[%s4566_s0 + $0x2b0] sm:$0xff]  ;;  %v57_v2 = vld [vmem:[%s4566_s0 + $0x148] sm:$0xff]  ;;  %v59_v3 = vld [vmem:[%s4566_s0 + $0x158] sm:$0xff] }
  0x20   :  { %v186_v22 = vpack.c.bf16 %v102_v20, %v100_v19  ;;  %v114_v58 = vld [vmem:[%s4566_s0 + $0x310] sm:$0xff]  ;;  %v165_v5 = vpack.c.bf16 %v59_v3, %v57_v2 }
  0x21   :  { %389 = vmatmul.bf16.vlgmr.msra.gmra.mxu0 %v144_v25  ;;  %v159_v25 = vpack.c.bf16 %v47_v24, %v45_v23  ;;  %v192_v0 = vpack.c.bf16 %v114_v58, %v112_v57  ;;  %v54_v14 = vld [vmem:[%s4566_s0 + $0x130] sm:$0xff] }
  0x22   :  { %469 = vmatmul.bf16.vlgmr.msra.gmra.mxu2 %v176_v26  ;;  %v113_v26 = vld [vmem:[%s4566_s0 + $0x308] sm:$0xff]  ;;  %v118_v19 = vld [vmem:[%s4566_s0 + $0x330] sm:$0xff] }
  0x23   :  { %v193_v30 = vpack.c.bf16 %v115_v27, %v113_v26  ;;  %v63_v27 = vld [vmem:[%s4566_s0 + $0x178] sm:$0xff] }
  0x26   :  { %2119 = vmatmul.msk.bf16.gmra.mxu1 %vm284_vm0, %v149_v29  ;;  %v42_v29 = vld [vmem:[%s4566_s0 + $0xd0] sm:$0xff] }
  0x27   :  { %v156_v33 = vpack.c.bf16 %v42_v29, %v40_v28  ;;  %v125_v29 = vld [vmem:[%s4566_s0 + $0x368] sm:$0xff] }
  0x28   :  { %2136 = vmatmul.msk.bf16.gmra.mxu3 %vm284_vm0, %v183_v32  ;;  %v106_v32 = vld [vmem:[%s4566_s0 + $0x2d0] sm:$0xff] }
  0x29   :  { %v188_v34 = vpack.c.bf16 %v106_v32, %v104_v31 }
  0x31   :  { %394 = vmatmul.bf16.gmra.mxu0 %v146_v37  ;;  %v161_v37 = vpack.c.bf16 %v51_v36, %v49_v35 }
  0x32   :  { %474 = vmatmul.bf16.gmra.mxu2 %v178_v38 }
  0x36   :  { %2120 = vmatmul.msk.bf16.gmra.mxu1 %vm284_vm0, %v151_v41  ;;  %v44_v41 = vld [vmem:[%s4566_s0 + $0xe0] sm:$0xff] }
  0x37   :  { %v158_v47 = vpack.c.bf16 %v46_v42, %v44_v41 }
  0x38   :  { %2137 = vmatmul.msk.bf16.gmra.mxu3 %vm284_vm0, %v185_v44 }
  0x41   :  { %399 = vmatmul.bf16.gmra.mxu0 %v148_v49  ;;  %v53_v49 = vld [vmem:[%s4566_s0 + $0x128] sm:$0xff] }
  0x42   :  { %479 = vmatmul.bf16.gmra.mxu2 %v180_v50  ;;  %v55_v50 = vld [vmem:[%s4566_s0 + $0x138] sm:$0xff] }
  0x43   :  { %v163_v51 = vpack.c.bf16 %v55_v50, %v53_v49 }
  0x46   :  { %2121 = vmatmul.msk.bf16.gmra.mxu1 %vm284_vm0, %v153_v53  ;;  %v48_v53 = vld [vmem:[%s4566_s0 + $0x100] sm:$0xff] }
  0x48   :  { %2138 = vmatmul.msk.bf16.gmra.mxu3 %vm284_vm0, %v187_v56  ;;  %v2810_v56 = vld [vmem:[%s4568_s2] ss:$0 sm:$0xff] }
  0x51   :  { %404 = vmatmul.bf16.gmra.mxu0 %v150_v61  ;;  %v160_v61 = vpack.c.bf16 %v50_v54, %v48_v53 }
  0x52   :  { %484 = vmatmul.bf16.gmra.mxu2 %v182_v62  ;;  %v197_v62 = vpack.c.bf16 %v123_v60, %v121_v59  ;;  %v122_v60 = vld [vmem:[%s4566_s0 + $0x350] sm:$0xff] }
  0x56   :  { %2122 = vmatmul.msk.bf16.gmra.mxu1 %vm284_vm0, %v155_v1 }
  0x58   :  { %2139 = vmatmul.msk.bf16.gmra.mxu3 %vm284_vm0, %v189_v4 }
  0x61   :  { %409 = vmatmul.bf16.gmra.mxu0 %v152_v9 }
  0x62   :  { %489 = vmatmul.bf16.gmra.mxu2 %v184_v10 }
  0x66   :  { %2123 = vmatmul.msk.bf16.gmra.mxu1 %vm284_vm0, %v157_v13  ;;  %v52_v13 = vld [vmem:[%s4566_s0 + $0x120] sm:$0xff] }
  0x68   :  { %2140 = vmatmul.msk.bf16.gmra.mxu3 %vm284_vm0, %v191_v18  ;;  %v116_v18 = vld [vmem:[%s4566_s0 + $0x320] sm:$0xff] }
  0x69   :  { %v194_v24 = vpack.c.bf16 %v118_v19, %v116_v18 }
  0x71   :  { %414 = vmatmul.bf16.gmra.mxu0 %v154_v21 }
  0x72   :  { %494 = vmatmul.bf16.gmra.mxu2 %v186_v22  ;;  %v162_v22 = vpack.c.bf16 %v54_v14, %v52_v13  ;;  %v65_v13 = vld [vmem:[%s4566_s0 + $0x188] sm:$0xff]  ;;  %v67_v14 = vld [vmem:[%s4566_s0 + $0x198] sm:$0xff] }
  0x76   :  { %2124 = vmatmul.msk.bf16.gmra.mxu1 %vm284_vm0, %v159_v25  ;;  %v61_v25 = vld [vmem:[%s4566_s0 + $0x168] sm:$0xff] }
  0x78   :  { %2141 = vmatmul.msk.bf16.gmra.mxu3 %vm284_vm0, %v193_v30  ;;  %v127_v30 = vld [vmem:[%s4566_s0 + $0x378] sm:$0xff] }
  0x79   :  { %v199_v31 = vpack.c.bf16 %v127_v30, %v125_v29 }
  0x81   :  { %419 = vmatmul.bf16.gmra.mxu0 %v156_v33  ;;  %v167_v33 = vpack.c.bf16 %v63_v27, %v61_v25 }
  0x82   :  { %499 = vmatmul.bf16.gmra.mxu2 %v188_v34 }
  0x83   :  { %v559_v38 = vpop.f32.mrf.mxu1 }
  0x86   :  { %2125 = vmatmul.msk.bf16.gmra.mxu1 %vm284_vm0, %v161_v37 }
  0x88   :  { %2142 = vmatmul.msk.bf16.gmra.mxu3 %vm284_vm0, %v195_v43 }
  0x8b   :  { %v561_v44 = vpop.f32.mrf.mxu1  ;;  %v644_v9 = vpop.f32.mrf.mxu3 }
  0x91   :  { %424 = vmatmul.bf16.gmra.mxu0 %v158_v47 }
  0x92   :  { %504 = vmatmul.bf16.gmra.mxu2 %v190_v48 }
  0x93   :  { %v564_v52 = vpop.f32.mrf.mxu1  ;;  %v2867_v28 = vpop.f32.mrf.mxu3 }
  0x96   :  { %2126 = vmatmul.msk.bf16.gmra.mxu1 %vm284_vm0, %v163_v51  ;;  %v56_v51 = vld [vmem:[%s4566_s0 + $0x140] sm:$0xff] }
  0x98   :  { %2143 = vmatmul.msk.bf16.gmra.mxu3 %vm284_vm0, %v197_v62 }
  0x9b   :  { %v2805_v55 = vpop.f32.mrf.mxu1  ;;  %v2892_v50 = vpop.f32.mrf.mxu3 }
  0x9e   :  { %v390_v63 = vpop.f32.mrf.mxu0 }
  0x9f   :  { %v391_v1 = vadd.f32 %v2810_v56, %v390_v63 }
  0xa1   :  { %v2832_v4 = vadd.f32 %v559_v38, %v391_v1  ;;  %429 = vmatmul.bf16.gmra.mxu0 %v160_v61 }
  0xa2   :  { %509 = vmatmul.bf16.gmra.mxu2 %v192_v0 }
  0xa3   :  { %v2149_v6 = vmul.f32 -1.442695, %v2832_v4  ;;  %v2835_v7 = vpop.f32.mrf.mxu1  ;;  %v2935_v27 = vpop.f32.mrf.mxu3 }
  0xa5   :  { %2235 = vpow2.f32 %v2149_v6  ;;  %v2837_v8 = vpop.f32.mrf.mxu2 }
  0xa6   :  { %2127 = vmatmul.msk.bf16.gmra.mxu1 %vm284_vm0, %v165_v5  ;;  %v392_v10 = vpop.f32.mrf.mxu0 }
  0xa7   :  { %v393_v11 = vadd.f32 %v2810_v56, %v392_v10 }
  0xa8   :  { %2144 = vmatmul.msk.bf16.gmra.mxu3 %vm284_vm0, %v199_v31 }
  0xa9   :  { %v2841_v12 = vadd.f32 %v561_v44, %v393_v11 }
  0xab   :  { %v2236_v15 = vpop.eup %2235  ;;  %v2150_v16 = vmul.f32 -1.442695, %v2841_v12  ;;  %v2850_v17 = vpop.f32.mrf.mxu1 }
  0xac   :  { %v911_v20 = vadd.f32 1.0, %v2236_v15 }
  0xad   :  { %2237 = vpow2.f32 %v2150_v16  ;;  %v2858_v21 = vpop.f32.mrf.mxu2 }
  0xae   :  { %2239 = vrcp.f32 %v911_v20  ;;  %v395_v23 = vpop.f32.mrf.mxu0  ;;  %v984_v45 = vand.u32 2147483647, %v911_v20  ;;  %v986_v46 = vand.u32 2147483648, %v911_v20  ;;  %vm980_vm2 = vweird.f32 %v911_v20 }
  0xaf   :  { %v396_v26 = vadd.f32 %v2810_v56, %v395_v23  ;;  %v169_v23 = vpack.c.bf16 %v67_v14, %v65_v13 }
  0xb0   :  { %v987_v62 = vor.u32 1.1754944e-38, %v986_v46  ;;  %vm985_vm4 = vcmp.eq.f32.partialorder %v984_v45, 8.507059e+37 }
  0xb1   :  { %v2875_v32 = vadd.f32 %v564_v52, %v396_v26  ;;  %434 = vmatmul.bf16.gmra.mxu0 %v162_v22  ;;  %v58_v52 = vld [vmem:[%s4566_s0 + $0x150] sm:$0xff] }
  0xb2   :  { %514 = vmatmul.bf16.gmra.mxu2 %v194_v24  ;;  %v164_v0 = vpack.c.bf16 %v58_v52, %v56_v51  ;;  %v2967_v51 = vld [vmem:[%s4566_s0 + $0x360] sm:$0xff]  ;;  %v2972_v52 = vld [vmem:[%s4566_s0 + $0x370] sm:$0xff] }
  0xb3   :  { %v2238_v34 = vpop.eup %2237  ;;  %v2151_v35 = vmul.f32 -1.442695, %v2875_v32  ;;  %v2879_v36 = vpop.f32.mrf.mxu1 }
  0xb4   :  { %v2240_v37 = vpop.eup %2239  ;;  %v2881_v38 = vadd.f32 1.0, %v2238_v34 }
  0xb5   :  { %v976_v39 = vmul.f32 %v2240_v37, %v911_v20  ;;  %2241 = vpow2.f32 %v2151_v35  ;;  %v475_v40 = vpop.f32.mrf.mxu2  ;;  %vm981_vm1 = vweird.f32 %v2240_v37 }
  0xb6   :  { %2243 = vrcp.f32 %v2881_v38  ;;  %2128 = vmatmul.msk.bf16.gmra.mxu1 %vm284_vm0, %v167_v33  ;;  %v397_v41 = vpop.f32.mrf.mxu0  ;;  %v476_v43 = vadd.f32 %v2810_v56, %v475_v40  ;;  %vm982_vm3 = vmor %vm980_vm2, %vm981_vm1  ;;  %v1001_v15 = vand.u32 2147483648, %v2881_v38  ;;  %vm995_vm6 = vweird.f32 %v2881_v38  ;;  %v2950_v33 = vld [vmem:[%s4566_s0 + $0x170] sm:$0xff] }
  0xb7   :  { %v977_v42 = vsub.f32 1.0, %v976_v39  ;;  %v398_v44 = vadd.f32 %v2810_v56, %v397_v41 }
  0xb8   :  { %v2887_v48 = vadd.f32 %v644_v9, %v476_v43  ;;  %v1002_v30 = vor.u32 1.1754944e-38, %v1001_v15 }
  0xb9   :  { %v978_v47 = vmul.f32 %v2240_v37, %v977_v42  ;;  %v2890_v49 = vadd.f32 %v2805_v55, %v398_v44  ;;  %v120_v55 = vld [vmem:[%s4566_s0 + $0x340] sm:$0xff] }
  0xba   :  { %v2183_v57 = vmul.f32 -1.442695, %v2887_v48  ;;  %v196_v9 = vpack.c.bf16 %v122_v60, %v120_v55  ;;  %v131_v55 = vld [vmem:[%s4566_s0 + $0x398] sm:$0xff] }
  0xbb   :  { %v2242_v53 = vpop.eup %2241  ;;  %v979_v54 = vadd.f32 %v2240_v37, %v978_v47  ;;  %v2152_v58 = vmul.f32 -1.442695, %v2890_v49  ;;  %v2902_v59 = vpop.f32.mrf.mxu1 }
  0xbc   :  { %v2244_v61 = vpop.eup %2243  ;;  %v2911_v63 = vadd.f32 1.0, %v2242_v53  ;;  %2245 = vpow2.f32 %v2183_v57  ;;  %v2985_v57 = vld [vmem:[%s4566_s0 + $0x1b8] sm:$0xff] }
  0xbd   :  { %v983_v1 = vsel %vm982_vm3, %v2240_v37, %v979_v54  ;;  %v991_v2 = vmul.f32 %v2244_v61, %v2881_v38  ;;  %v477_v3 = vpop.f32.mrf.mxu2  ;;  %vm996_vm5 = vweird.f32 %v2244_v61 }
  0xbe   :  { %v988_v5 = vsel %vm985_vm4, %v987_v62, %v983_v1  ;;  %2247 = vrcp.f32 %v2911_v63  ;;  %v400_v6 = vpop.f32.mrf.mxu0  ;;  %v478_v16 = vadd.f32 %v2810_v56, %v477_v3  ;;  %vm997_vm7 = vmor %vm995_vm6, %vm996_vm5  ;;  %v1016_v41 = vand.u32 2147483648, %v2911_v63 }
  0xbf   :  { %v1935_v10 = vmul.f32 %v988_v5, %v2832_v4  ;;  %v992_v11 = vsub.f32 1.0, %v991_v2  ;;  %2249 = vpow2.f32 %v2152_v58  ;;  %v401_v18 = vadd.f32 %v2810_v56, %v400_v6  ;;  %v129_v58 = vld [vmem:[%s4566_s0 + $0x388] sm:$0xff] }
  0xc0   :  { %v999_v4 = vand.u32 2147483647, %v2881_v38  ;;  %v2927_v20 = vadd.f32 %v2867_v28, %v478_v16  ;;  %v1014_v38 = vand.u32 2147483647, %v2911_v63  ;;  %vm1010_vm9 = vweird.f32 %v2911_v63 }
  0xc1   :  { %1999 = vst [vmem:[#allocation2] sm:$0xff] %v1935_v10  ;;  %v993_v19 = vmul.f32 %v2244_v61, %v992_v11  ;;  %439 = vmatmul.bf16.gmra.mxu0 %v164_v0  ;;  %v2930_v22 = vadd.f32 %v2835_v7, %v401_v18  ;;  %v2945_v7 = vld [vmem:[%s4566_s0 + $0x160] sm:$0xff]  ;;  %v1017_v62 = vor.u32 1.1754944e-38, %v1016_v41  ;;  %v198_v1 = vpack.c.bf16 %v2972_v52, %v2967_v51 }
  0xc2   :  { %519 = vmatmul.bf16.gmra.mxu2 %v196_v9  ;;  %v2246_v24 = vpop.eup %2245  ;;  %v2184_v28 = vmul.f32 -1.442695, %v2927_v20  ;;  %vm1000_vm8 = vcmp.eq.f32.partialorder %v999_v4, 8.507059e+37  ;;  %v166_v47 = vpack.c.bf16 %v2950_v33, %v2945_v7  ;;  %vm2995_vm11 = vcmp.eq.f32.partialorder %v1014_v38, 8.507059e+37 }
  0xc3   :  { %v994_v25 = vadd.f32 %v2244_v61, %v993_v19  ;;  %v2933_v26 = vpop.f32.mrf.mxu1  ;;  %v2939_v31 = vadd.f32 1.0, %v2246_v24  ;;  %v2153_v42 = vmul.f32 -1.442695, %v2930_v22  ;;  %v201_v9 = vpack.c.bf16 %v131_v55, %v129_v58 }
  0xc4   :  { %v2937_v29 = vpop.eup %2247 }
  0xc5   :  { %v2250_v34 = vpop.eup %2249  ;;  %v998_v35 = vsel %vm997_vm7, %v2244_v61, %v994_v25  ;;  %v1006_v37 = vmul.f32 %v2937_v29, %v2911_v63  ;;  %v480_v39 = vpop.f32.mrf.mxu2  ;;  %2251 = vrcp.f32 %v2939_v31  ;;  %vm1011_vm10 = vweird.f32 %v2937_v29  ;;  %2145 = vmatmul.msk.bf16.gmra.mxu3 %vm284_vm0, %v201_v9 }
  0xc6   :  { %v1003_v40 = vsel %vm1000_vm8, %v1002_v30, %v998_v35  ;;  %2129 = vmatmul.msk.bf16.gmra.mxu1 %vm284_vm0, %v169_v23  ;;  %v402_v43 = vpop.f32.mrf.mxu0  ;;  %v2960_v46 = vadd.f32 1.0, %v2250_v34  ;;  %2253 = vpow2.f32 %v2184_v28  ;;  %v481_v53 = vadd.f32 %v2810_v56, %v480_v39  ;;  %vm1012_vm12 = vmor %vm1010_vm9, %vm1011_vm10  ;;  %v3026_v63 = vpop.f32.mrf.mxu3  ;;  %v3055_v39 = vld [vmem:[%s4566_s0 + $0x190] sm:$0xff] }
  0xc7   :  { %v1936_v44 = vmul.f32 %v1003_v40, %v2841_v12  ;;  %v1007_v45 = vsub.f32 1.0, %v1006_v37  ;;  %v2977_v12 = vld [vmem:[%s4566_s0 + $0x1a8] sm:$0xff]  ;;  %v403_v54 = vadd.f32 %v2810_v56, %v402_v43  ;;  %vm1490_vm13 = vweird.f32 %v2939_v31 }
  0xc8   :  { %2255 = vrcp.f32 %v2960_v46  ;;  %v3001_v0 = vadd.f32 %v2892_v50, %v481_v53  ;;  %v171_v6 = vpack.c.bf16 %v2985_v57, %v2977_v12  ;;  %v1494_v50 = vand.u32 2147483647, %v2939_v31 }
  0xc9   :  { %2000 = vst [vmem:[#allocation2 + $0x8] sm:$0xff] %v1936_v44  ;;  %v1008_v60 = vmul.f32 %v2937_v29, %v1007_v45  ;;  %2257 = vpow2.f32 %v2153_v42  ;;  %v3007_v3 = vadd.f32 %v2850_v17, %v403_v54  ;;  %v1496_v11 = vand.u32 2147483648, %v2939_v31  ;;  %v3076_v45 = vld [vmem:[%s4566_s0 + $0x390] sm:$0xff] }
  0xca   :  { %v2185_v17 = vmul.f32 -1.442695, %v3001_v0  ;;  %v1029_v15 = vand.u32 2147483647, %v2960_v46  ;;  %v1031_v23 = vand.u32 2147483648, %v2960_v46  ;;  %vm3038_vm14 = vcmp.eq.f32.partialorder %v1494_v50, 8.507059e+37 }
  0xcb   :  { %v1009_v2 = vadd.f32 %v2937_v29, %v1008_v60  ;;  %v3009_v5 = vpop.f32.mrf.mxu1  ;;  %v3013_v10 = vpop.eup %2251  ;;  %v2154_v16 = vmul.f32 -1.442695, %v3007_v3  ;;  %v1497_v35 = vor.u32 1.1754944e-38, %v1496_v11  ;;  %vm1025_vm1 = vweird.f32 %v2960_v46  ;;  %v3101_v50 = vld [vmem:[%s4566_s0 + $0x1c8] sm:$0xff]  ;;  %v3106_v11 = vld [vmem:[%s4566_s0 + $0x1d8] sm:$0xff] }
  0xcc   :  { %v1486_v14 = vmul.f32 %v3013_v10, %v2939_v31  ;;  %v2254_v19 = vpop.eup %2253  ;;  %2259 = vpow2.f32 %v2185_v17  ;;  %vm1491_vm15 = vweird.f32 %v3013_v10  ;;  %vm3066_vm2 = vcmp.eq.f32.partialorder %v1029_v15, 8.507059e+37 }
  0xcd   :  { %v1013_v13 = vsel %vm1012_vm12, %v2937_v29, %v1009_v2  ;;  %v482_v18 = vpop.f32.mrf.mxu2  ;;  %v3036_v7 = vadd.f32 1.0, %v2254_v19  ;;  %2261 = vpow2.f32 %v2154_v16  ;;  %v1032_v51 = vor.u32 1.1754944e-38, %v1031_v23  ;;  %vm1492_vm4 = vmor %vm1490_vm13, %vm1491_vm15 }
  0xce   :  { %v1018_v4 = vsel %vm2995_vm11, %v1017_v62, %v1013_v13  ;;  %v483_v24 = vadd.f32 %v2810_v56, %v482_v18  ;;  %v405_v25 = vpop.f32.mrf.mxu0  ;;  %v3033_v29 = vpop.eup %2255  ;;  %v1487_v28 = vsub.f32 1.0, %v1486_v14 }
  0xcf   :  { %v1937_v30 = vmul.f32 %v1018_v4, %v2875_v32  ;;  %v2258_v33 = vpop.eup %2257  ;;  %v1021_v37 = vmul.f32 %v3033_v29, %v2960_v46  ;;  %v3050_v32 = vld [vmem:[%s4566_s0 + $0x180] sm:$0xff]  ;;  %2263 = vrcp.f32 %v3036_v7  ;;  %vm1026_vm3 = vweird.f32 %v3033_v29  ;;  %v3126_v4 = vpop.f32.mrf.mxu3 }
  0xd0   :  { %v3045_v38 = vadd.f32 %v2935_v27, %v483_v24  ;;  %v1488_v40 = vmul.f32 %v3013_v10, %v1487_v28  ;;  %v3064_v27 = vld [vmem:[%s4566_s0 + $0x380] sm:$0xff]  ;;  %v3070_v43 = vadd.f32 1.0, %v2258_v33  ;;  %v168_v53 = vpack.c.bf16 %v3055_v39, %v3050_v32  ;;  %vm1027_vm6 = vmor %vm1025_vm1, %vm1026_vm3 }
  0xd1   :  { %2001 = vst [vmem:[#allocation2 + $0x10] sm:$0xff] %v1937_v30  ;;  %444 = vmatmul.bf16.gmra.mxu0 %v166_v47  ;;  %v1022_v41 = vsub.f32 1.0, %v1021_v37  ;;  %v1509_v55 = vand.u32 2147483647, %v3036_v7  ;;  %v406_v60 = vadd.f32 %v2810_v56, %v405_v25  ;;  %v200_v31 = vpack.c.bf16 %v3076_v45, %v3064_v27 }
  0xd2   :  { %v2186_v44 = vmul.f32 -1.442695, %v3045_v38  ;;  %524 = vmatmul.bf16.gmra.mxu2 %v198_v1  ;;  %v1489_v47 = vadd.f32 %v3013_v10, %v1488_v40  ;;  %v2260_v54 = vpop.eup %2259  ;;  %2265 = vrcp.f32 %v3070_v43  ;;  %v1511_v1 = vand.u32 2147483648, %v3036_v7 }
  0xd3   :  { %v3080_v52 = vpop.f32.mrf.mxu1  ;;  %v1023_v58 = vmul.f32 %v3033_v29, %v1022_v41  ;;  %v2262_v61 = vpop.eup %2261  ;;  %v3094_v2 = vadd.f32 1.0, %v2260_v54  ;;  %vm1505_vm5 = vweird.f32 %v3036_v7  ;;  %v1044_v18 = vand.u32 2147483647, %v3070_v43 }
  0xd4   :  { %v1493_v62 = vsel %vm1492_vm4, %v3013_v10, %v1489_v47  ;;  %v3112_v13 = vadd.f32 1.0, %v2262_v61  ;;  %2267 = vpow2.f32 %v2186_v44  ;;  %v1046_v19 = vand.u32 2147483648, %v3070_v43  ;;  %v135_v61 = vld [vmem:[%s4566_s0 + $0x3b8] sm:$0xff] }
  0xd5   :  { %v485_v9 = vpop.f32.mrf.mxu2  ;;  %v1498_v10 = vsel %vm3038_vm14, %v1497_v35, %v1493_v62  ;;  %v1024_v17 = vadd.f32 %v3033_v29, %v1023_v58  ;;  %v2264_v15 = vpop.eup %2263  ;;  %2269 = vrcp.f32 %v3094_v2  ;;  %vm3130_vm7 = vcmp.eq.f32.partialorder %v1509_v55, 8.507059e+37 }
  0xd6   :  { %2130 = vmatmul.msk.bf16.gmra.mxu1 %vm284_vm0, %v171_v6  ;;  %v407_v14 = vpop.f32.mrf.mxu0  ;;  %v1969_v16 = vmul.f32 %v1498_v10, %v2887_v48  ;;  %v1501_v57 = vmul.f32 %v2264_v15, %v3036_v7  ;;  %v3135_v48 = vadd.f32 %v2879_v36, %v406_v60  ;;  %v173_v46 = vpack.c.bf16 %v3106_v11, %v3101_v50 }
  0xd7   :  { %v1028_v12 = vsel %vm1027_vm6, %v3033_v29, %v1024_v17  ;;  %v1512_v24 = vor.u32 1.1754944e-38, %v1511_v1  ;;  %v1526_v25 = vand.u32 2147483648, %v3094_v2  ;;  %2271 = vrcp.f32 %v3112_v13 }
  0xd8   :  { %2033 = vst [vmem:[#allocation2 + $0x110] sm:$0xff] %v1969_v16  ;;  %v1033_v23 = vsel %vm3066_vm2, %v1032_v51, %v1028_v12  ;;  %v2266_v29 = vpop.eup %2265  ;;  %v1502_v28 = vsub.f32 1.0, %v1501_v57  ;;  %vm1040_vm8 = vweird.f32 %v3070_v43  ;;  %v1524_v36 = vand.u32 2147483647, %v3094_v2 }
  0xd9   :  { %v1938_v30 = vmul.f32 %v1033_v23, %v2890_v49  ;;  %vm1506_vm9 = vweird.f32 %v2264_v15  ;;  %v1036_v33 = vmul.f32 %v2266_v29, %v3070_v43  ;;  %vm3147_vm10 = vcmp.eq.f32.partialorder %v1044_v18, 8.507059e+37 }
  0xda   :  { %v1047_v35 = vor.u32 1.1754944e-38, %v1046_v19  ;;  %v2268_v40 = vpop.eup %2267  ;;  %v1503_v41 = vmul.f32 %v2264_v15, %v1502_v28  ;;  %vm1520_vm11 = vweird.f32 %v3094_v2  ;;  %v1059_v49 = vand.u32 2147483647, %v3112_v13  ;;  %vm1507_vm15 = vmor %vm1505_vm5, %vm1506_vm9  ;;  %v659_v28 = vpop.f32.mrf.mxu3 }
  0xdb   :  { %v3151_v37 = vpop.f32.mrf.mxu1  ;;  %2002 = vst [vmem:[#allocation2 + $0x18] sm:$0xff] %v1938_v30  ;;  %v1061_v42 = vand.u32 2147483648, %v3112_v13  ;;  %v2270_v44 = vpop.eup %2269  ;;  %v1037_v47 = vsub.f32 1.0, %v1036_v33  ;;  %vm1041_vm12 = vweird.f32 %v2266_v29  ;;  %v1527_v51 = vor.u32 1.1754944e-38, %v1526_v25 }
  0xdc   :  { %v3156_v54 = vadd.f32 1.0, %v2268_v40  ;;  %v1504_v55 = vadd.f32 %v2264_v15, %v1503_v41  ;;  %v1516_v60 = vmul.f32 %v2270_v44, %v3094_v2  ;;  %vm3159_vm13 = vcmp.eq.f32.partialorder %v1524_v36, 8.507059e+37  ;;  %vm1042_vm4 = vmor %vm1040_vm8, %vm1041_vm12 }
  0xdd   :  { %v487_v58 = vpop.f32.mrf.mxu2  ;;  %vm1055_vm14 = vweird.f32 %v3112_v13  ;;  %v2155_v62 = vmul.f32 -1.442695, %v3135_v48  ;;  %v486_v1 = vadd.f32 %v2810_v56, %v485_v9  ;;  %v2272_v17 = vpop.eup %2271  ;;  %v1038_v16 = vmul.f32 %v2266_v29, %v1037_v47 }
  0xde   :  { %v410_v10 = vpop.f32.mrf.mxu0  ;;  %vm1521_vm1 = vweird.f32 %v2270_v44  ;;  %2273 = vrcp.f32 %v3156_v54  ;;  %v408_v18 = vadd.f32 %v2810_v56, %v407_v14  ;;  %v1508_v19 = vsel %vm1507_vm15, %v2264_v15, %v1504_v55 }
  0xdf   :  { %v1517_v12 = vsub.f32 1.0, %v1516_v60  ;;  %v1051_v57 = vmul.f32 %v2272_v17, %v3112_v13  ;;  %vm3172_vm2 = vcmp.eq.f32.partialorder %v1059_v49, 8.507059e+37  ;;  %v1062_v9 = vor.u32 1.1754944e-38, %v1061_v42  ;;  %vm1522_vm5 = vmor %vm1520_vm11, %vm1521_vm1  ;;  %v133_v60 = vld [vmem:[%s4566_s0 + $0x3a8] sm:$0xff] }
  0xe0   :  { %v1513_v25 = vsel %vm3130_vm7, %v1512_v24, %v1508_v19  ;;  %v1039_v7 = vadd.f32 %v2266_v29, %v1038_v16  ;;  %vm1056_vm3 = vweird.f32 %v2272_v17  ;;  %v1539_v30 = vand.u32 2147483647, %v3156_v54 }
  0xe1   :  { %449 = vmatmul.bf16.gmra.mxu0 %v168_v53  ;;  %v1970_v14 = vmul.f32 %v1513_v25, %v2927_v20  ;;  %v1518_v15 = vmul.f32 %v2270_v44, %v1517_v12  ;;  %v1052_v36 = vsub.f32 1.0, %v1051_v57  ;;  %2275 = vpow2.f32 %v2155_v62  ;;  %vm1057_vm7 = vmor %vm1055_vm14, %vm1056_vm3 }
  0xe2   :  { %529 = vmatmul.bf16.gmra.mxu2 %v200_v31  ;;  %v1043_v6 = vsel %vm1042_vm4, %v2266_v29, %v1039_v7  ;;  %v1541_v24 = vand.u32 2147483648, %v3156_v54  ;;  %v3191_v33 = vadd.f32 %v3026_v63, %v486_v1  ;;  %v3194_v32 = vadd.f32 %v2902_v59, %v408_v18  ;;  %v3242_v62 = vpop.f32.mrf.mxu3 }
  0xe3   :  { %v3196_v20 = vpop.f32.mrf.mxu1  ;;  %2034 = vst [vmem:[#allocation2 + $0x118] sm:$0xff] %v1970_v14  ;;  %v1048_v39 = vsel %vm3147_vm10, %v1047_v35, %v1043_v6  ;;  %v1519_v43 = vadd.f32 %v2270_v44, %v1518_v15  ;;  %v1053_v53 = vmul.f32 %v2272_v17, %v1052_v36  ;;  %v488_v27 = vadd.f32 %v2810_v56, %v487_v58 }
  0xe4   :  { %v2274_v45 = vpop.eup %2273  ;;  %v1939_v31 = vmul.f32 %v1048_v39, %v2930_v22  ;;  %v2187_v59 = vmul.f32 -1.442695, %v3191_v33  ;;  %v2156_v63 = vmul.f32 -1.442695, %v3194_v32  ;;  %v411_v29 = vadd.f32 %v2810_v56, %v410_v10 }
  0xe5   :  { %v490_v40 = vpop.f32.mrf.mxu2  ;;  %v1523_v34 = vsel %vm1522_vm5, %v2270_v44, %v1519_v43  ;;  %v1054_v35 = vadd.f32 %v2272_v17, %v1053_v53  ;;  %v1531_v41 = vmul.f32 %v2274_v45, %v3156_v54  ;;  %vm1536_vm6 = vweird.f32 %v2274_v45 }
  0xe6   :  { %2131 = vmatmul.msk.bf16.gmra.mxu1 %vm284_vm0, %v173_v46  ;;  %v412_v22 = vpop.f32.mrf.mxu0  ;;  %2003 = vst [vmem:[#allocation2 + $0x20] sm:$0xff] %v1939_v31  ;;  %v1528_v2 = vsel %vm3159_vm13, %v1527_v51, %v1523_v34  ;;  %2277 = vpow2.f32 %v2187_v59  ;;  %v3219_v49 = vadd.f32 %v3126_v4, %v488_v27  ;;  %v3222_v42 = vadd.f32 %v2933_v26, %v411_v29 }
  0xe7   :  { %v2276_v44 = vpop.eup %2275  ;;  %v1971_v50 = vmul.f32 %v1528_v2, %v3001_v0  ;;  %v1058_v11 = vsel %vm1057_vm7, %v2272_v17, %v1054_v35  ;;  %v1532_v46 = vsub.f32 1.0, %v1531_v41  ;;  %2279 = vpow2.f32 %v2156_v63 }
  0xe8   :  { %v1063_v47 = vsel %vm3172_vm2, %v1062_v9, %v1058_v11  ;;  %v3227_v51 = vadd.f32 1.0, %v2276_v44  ;;  %v2188_v13 = vmul.f32 -1.442695, %v3219_v49  ;;  %v2157_v58 = vmul.f32 -1.442695, %v3222_v42 }
  0xe9   :  { %2035 = vst [vmem:[#allocation2 + $0x120] sm:$0xff] %v1971_v50  ;;  %v1940_v4 = vmul.f32 %v1063_v47, %v3007_v3  ;;  %v1533_v26 = vmul.f32 %v2274_v45, %v1532_v46  ;;  %v491_v55 = vadd.f32 %v2810_v56, %v490_v40  ;;  %v413_v0 = vadd.f32 %v2810_v56, %v412_v22 }
  0xea   :  { %vm1535_vm8 = vweird.f32 %v3156_v54  ;;  %2281 = vrcp.f32 %v3227_v51  ;;  %vm1540_vm10 = vcmp.eq.f32.partialorder %v1539_v30, 8.507059e+37  ;;  %v1542_v18 = vor.u32 1.1754944e-38, %v1541_v24  ;;  %v3286_v22 = vpop.f32.mrf.mxu3 }
  0xeb   :  { %v3244_v3 = vpop.f32.mrf.mxu1  ;;  %2004 = vst [vmem:[#allocation2 + $0x28] sm:$0xff] %v1940_v4  ;;  %v1534_v1 = vadd.f32 %v2274_v45, %v1533_v26  ;;  %2283 = vpow2.f32 %v2188_v13  ;;  %v3246_v10 = vadd.f32 %v659_v28, %v491_v55  ;;  %v3249_v17 = vadd.f32 %v3009_v5, %v413_v0  ;;  %vm1537_vm9 = vmor %vm1535_vm8, %vm1536_vm6  ;;  %v70_v4 = vld [vmem:[%s4566_s0 + $0x1b0] sm:$0xff] }
  0xec   :  { %v2278_v16 = vpop.eup %2277  ;;  %2285 = vpow2.f32 %v2157_v58  ;;  %v203_v19 = vpack.c.bf16 %v135_v61, %v133_v60  ;;  %v1074_v9 = vand.u32 2147483647, %v3227_v51  ;;  %v1076_v25 = vand.u32 2147483648, %v3227_v51  ;;  %v68_v58 = vld [vmem:[%s4566_s0 + $0x1a0] sm:$0xff] }
  0xed   :  { %v492_v12 = vpop.f32.mrf.mxu2  ;;  %v2280_v57 = vpop.eup %2279  ;;  %v1538_v23 = vsel %vm1537_vm9, %v2274_v45, %v1534_v1  ;;  %v3256_v7 = vadd.f32 1.0, %v2278_v16  ;;  %v2189_v15 = vmul.f32 -1.442695, %v3246_v10  ;;  %v2158_v30 = vmul.f32 -1.442695, %v3249_v17 }
  0xee   :  { %v415_v5 = vpop.f32.mrf.mxu0  ;;  %v1543_v28 = vsel %vm1540_vm10, %v1542_v18, %v1538_v23  ;;  %v3258_v14 = vadd.f32 1.0, %v2280_v57  ;;  %2146 = vmatmul.msk.bf16.gmra.mxu3 %vm284_vm0, %v203_v19  ;;  %vm1070_vm11 = vweird.f32 %v3227_v51  ;;  %vm3268_vm12 = vcmp.eq.f32.partialorder %v1074_v9, 8.507059e+37 }
  0xef   :  { %v1972_v54 = vmul.f32 %v1543_v28, %v3045_v38  ;;  %2287 = vrcp.f32 %v3256_v7  ;;  %v1077_v43 = vor.u32 1.1754944e-38, %v1076_v25  ;;  %v1554_v38 = vand.u32 2147483647, %v3256_v7 }
  0xf0   :  { %v2282_v36 = vpop.eup %2281  ;;  %2289 = vrcp.f32 %v3258_v14  ;;  %v1556_v27 = vand.u32 2147483648, %v3256_v7  ;;  %v1089_v45 = vand.u32 2147483647, %v3258_v14  ;;  %v1091_v29 = vand.u32 2147483648, %v3258_v14 }
  0xf1   :  { %v2284_v6 = vpop.eup %2283  ;;  %2036 = vst [vmem:[#allocation2 + $0x128] sm:$0xff] %v1972_v54  ;;  %v1066_v24 = vmul.f32 %v2282_v36, %v3227_v51  ;;  %2291 = vpow2.f32 %v2189_v15  ;;  %v493_v35 = vadd.f32 %v2810_v56, %v492_v12  ;;  %v416_v41 = vadd.f32 %v2810_v56, %v415_v5 }
  0xf2   :  { %v2286_v53 = vpop.eup %2285  ;;  %v3275_v31 = vadd.f32 1.0, %v2284_v6  ;;  %2293 = vpow2.f32 %v2158_v30  ;;  %vm1071_vm13 = vweird.f32 %v2282_v36  ;;  %vm1550_vm14 = vweird.f32 %v3256_v7 }
  0xf3   :  { %v3277_v59 = vpop.f32.mrf.mxu1  ;;  %v1067_v63 = vsub.f32 1.0, %v1066_v24  ;;  %v3280_v40 = vadd.f32 1.0, %v2286_v53  ;;  %vm3300_vm15 = vcmp.eq.f32.partialorder %v1554_v38, 8.507059e+37  ;;  %v1557_v13 = vor.u32 1.1754944e-38, %v1556_v27  ;;  %vm1072_vm3 = vmor %vm1070_vm11, %vm1071_vm13 }
  0xf4   :  { %2295 = vrcp.f32 %v3275_v31  ;;  %v1571_v34 = vand.u32 2147483648, %v3275_v31  ;;  %vm1085_vm1 = vweird.f32 %v3258_v14  ;;  %vm3313_vm2 = vcmp.eq.f32.partialorder %v1089_v45, 8.507059e+37 }
  0xf5   :  { %v3288_v2 = vpop.f32.mrf.mxu2  ;;  %v3290_v44 = vpop.eup %2287  ;;  %v1068_v50 = vmul.f32 %v2282_v36, %v1067_v63  ;;  %2297 = vrcp.f32 %v3280_v40  ;;  %v1092_v60 = vor.u32 1.1754944e-38, %v1091_v29  ;;  %v1569_v61 = vand.u32 2147483647, %v3275_v31 }
  0xf6   :  { %v3294_v11 = vpop.f32.mrf.mxu0  ;;  %v3296_v46 = vpop.eup %2289  ;;  %v1546_v47 = vmul.f32 %v3290_v44, %v3256_v7  ;;  %vm1551_vm4 = vweird.f32 %v3290_v44  ;;  %v3322_v18 = vor.u32 1.1754944e-38, %v1571_v34  ;;  %v1104_v19 = vand.u32 2147483647, %v3280_v40 }
  0xf7   :  { %v1069_v26 = vadd.f32 %v2282_v36, %v1068_v50  ;;  %v1081_v55 = vmul.f32 %v3296_v46, %v3258_v14  ;;  %v2292_v1 = vpop.eup %2291  ;;  %vm1565_vm5 = vweird.f32 %v3275_v31  ;;  %v170_v25 = vpack.c.bf16 %v70_v4, %v68_v58  ;;  %vm1552_vm9 = vmor %vm1550_vm14, %vm1551_vm4  ;;  %v3377_v50 = vpop.f32.mrf.mxu3 }
  0xf8   :  { %v1547_v16 = vsub.f32 1.0, %v1546_v47  ;;  %v2294_v12 = vpop.eup %2293  ;;  %v3326_v9 = vadd.f32 1.0, %v2292_v1  ;;  %vm1086_vm6 = vweird.f32 %v3296_v46  ;;  %vm1100_vm7 = vweird.f32 %v3280_v40 }
  0xf9   :  { %v1073_v57 = vsel %vm1072_vm3, %v2282_v36, %v1069_v26  ;;  %v1082_v23 = vsub.f32 1.0, %v1081_v55  ;;  %v3335_v15 = vadd.f32 1.0, %v2294_v12  ;;  %vm3345_vm8 = vcmp.eq.f32.partialorder %v1569_v61, 8.507059e+37  ;;  %454 = vmatmul.bf16.gmra.mxu0 %v170_v25  ;;  %vm1087_vm11 = vmor %vm1085_vm1, %vm1086_vm6 }
  0xfa   :  { %v3328_v5 = vpop.eup %2295  ;;  %v1078_v51 = vsel %vm3268_vm12, %v1077_v43, %v1073_v57  ;;  %v1548_v28 = vmul.f32 %v3290_v44, %v1547_v16  ;;  %v1106_v43 = vand.u32 2147483648, %v3280_v40  ;;  %2299 = vrcp.f32 %v3326_v9 }
  0xfb   :  { %v3337_v54 = vpop.f32.mrf.mxu1  ;;  %v3339_v30 = vpop.eup %2297  ;;  %v1941_v36 = vmul.f32 %v1078_v51, %v3135_v48  ;;  %v1083_v6 = vmul.f32 %v3296_v46, %v1082_v23  ;;  %v1561_v24 = vmul.f32 %v3328_v5, %v3275_v31  ;;  %v3355_v48 = vadd.f32 %v3242_v62, %v493_v35  ;;  %v132_v23 = vld [vmem:[%s4566_s0 + $0x3a0] sm:$0xff] }
  0xfc   :  { %v1549_v38 = vadd.f32 %v3290_v44, %v1548_v28  ;;  %v1096_v53 = vmul.f32 %v3339_v30, %v3280_v40  ;;  %vm1566_vm10 = vweird.f32 %v3328_v5  ;;  %v3366_v29 = vadd.f32 %v3080_v52, %v416_v41  ;;  %v134_v40 = vld [vmem:[%s4566_s0 + $0x3b0] sm:$0xff] }
  0xfd   :  { %v3357_v27 = vpop.f32.mrf.mxu2  ;;  %2005 = vst [vmem:[#allocation2 + $0x30] sm:$0xff] %v1941_v36  ;;  %v1084_v45 = vadd.f32 %v3296_v46, %v1083_v6  ;;  %v1562_v63 = vsub.f32 1.0, %v1561_v24  ;;  %v1584_v7 = vand.u32 2147483647, %v3326_v9  ;;  %2301 = vrcp.f32 %v3335_v15  ;;  %vm3401_vm14 = vmor %vm1565_vm5, %vm1566_vm10  ;;  %v77_v36 = vld [vmem:[%s4566_s0 + $0x1e8] sm:$0xff]  ;;  %v79_v6 = vld [vmem:[%s4566_s0 + $0x1f8] sm:$0xff] }
  0xfe   :  { %v3368_v34 = vpop.f32.mrf.mxu0  ;;  %v1553_v62 = vsel %vm1552_vm9, %v3290_v44, %v1549_v38  ;;  %v1097_v35 = vsub.f32 1.0, %v1096_v53  ;;  %v1586_v44 = vand.u32 2147483648, %v3326_v9  ;;  %vm1101_vm12 = vweird.f32 %v3339_v30  ;;  %v137_v38 = vld [vmem:[%s4566_s0 + $0x3c8] sm:$0xff]  ;;  %v139_v53 = vld [vmem:[%s4566_s0 + $0x3d8] sm:$0xff] }
  0xff   :  { %v1558_v52 = vsel %vm3300_vm15, %v1557_v13, %v1553_v62  ;;  %v1088_v41 = vsel %vm1087_vm11, %v3296_v46, %v1084_v45  ;;  %v1563_v47 = vmul.f32 %v3328_v5, %v1562_v63  ;;  %vm3391_vm13 = vcmp.eq.f32.partialorder %v1104_v19, 8.507059e+37  ;;  %vm3418_vm1 = vmor %vm1100_vm7, %vm1101_vm12 }
 0x100   :  { %v1973_v58 = vmul.f32 %v1558_v52, %v3191_v33  ;;  %v1093_v14 = vsel %vm3313_vm2, %v1092_v60, %v1088_v41  ;;  %v1098_v4 = vmul.f32 %v3339_v30, %v1097_v35  ;;  %v1107_v46 = vor.u32 1.1754944e-38, %v1106_v43  ;;  %v3395_v55 = vpop.eup %2299 }
 0x101   :  { %v1942_v26 = vmul.f32 %v1093_v14, %v3194_v32  ;;  %v1564_v56 = vadd.f32 %v3328_v5, %v1563_v47  ;;  %vm1580_vm15 = vweird.f32 %v3326_v9  ;;  %v2190_v0 = vmul.f32 -1.442695, %v3355_v48  ;;  %v74_v47 = vld [vmem:[%s4566_s0 + $0x1d0] sm:$0xff]  ;;  %v669_v14 = vpop.f32.mrf.mxu3 }
 0x102   :  { %2037 = vst [vmem:[#allocation2 + $0x130] sm:$0xff] %v1973_v58  ;;  %v1099_v32 = vadd.f32 %v3339_v30, %v1098_v4  ;;  %v2159_v60 = vmul.f32 -1.442695, %v3366_v29  ;;  %v1576_v16 = vmul.f32 %v3395_v55, %v3326_v9  ;;  %vm3424_vm2 = vcmp.eq.f32.partialorder %v1584_v7, 8.507059e+37  ;;  %v3471_v7 = vld [vmem:[%s4568_s2] ss:$0 sm:$0xff] }
 0x103   :  { %v3409_v61 = vpop.f32.mrf.mxu1  ;;  %2006 = vst [vmem:[#allocation2 + $0x38] sm:$0xff] %v1942_v26  ;;  %v1568_v1 = vsel %vm3401_vm14, %v3328_v5, %v1564_v56  ;;  %v1587_v12 = vor.u32 1.1754944e-38, %v1586_v44  ;;  %v1119_v57 = vand.u32 2147483647, %v3335_v15  ;;  %v3435_v25 = vpop.eup %2301  ;;  %v1121_v28 = vand.u32 2147483648, %v3335_v15 }
 0x104   :  { %v1573_v5 = vsel %vm3345_vm8, %v3322_v18, %v1568_v1  ;;  %v1103_v51 = vsel %vm3418_vm1, %v3339_v30, %v1099_v32  ;;  %2303 = vpow2.f32 %v2190_v0  ;;  %v1577_v43 = vsub.f32 1.0, %v1576_v16 }
 0x105   :  { %v3450_v24 = vpop.f32.mrf.mxu2  ;;  %v1974_v39 = vmul.f32 %v1573_v5, %v3219_v49  ;;  %v1108_v18 = vsel %vm3391_vm13, %v1107_v46, %v1103_v51  ;;  %v1111_v30 = vmul.f32 %v3435_v25, %v3335_v15  ;;  %vm1581_vm3 = vweird.f32 %v3395_v55  ;;  %v136_v51 = vld [vmem:[%s4566_s0 + $0x3c0] sm:$0xff] }
 0x106   :  { %v1943_v45 = vmul.f32 %v1108_v18, %v3222_v42  ;;  %2305 = vpow2.f32 %v2159_v60  ;;  %v202_v49 = vpack.c.bf16 %v134_v40, %v132_v23  ;;  %v3465_v63 = vpop.f32.mrf.mxu0  ;;  %v1578_v62 = vmul.f32 %v3395_v55, %v1577_v43  ;;  %v72_v42 = vld [vmem:[%s4566_s0 + $0x1c0] sm:$0xff]  ;;  %vm1582_vm5 = vmor %vm1580_vm15, %vm1581_vm3  ;;  %v141_v18 = vld [vmem:[%s4566_s0 + $0x3e8] sm:$0xff] }
 0x107   :  { %2038 = vst [vmem:[#allocation2 + $0x138] sm:$0xff] %v1974_v39  ;;  %v1112_v35 = vsub.f32 1.0, %v1111_v30  ;;  %v496_v52 = vadd.f32 %v3471_v7, %v3288_v2  ;;  %v175_v41 = vpack.c.bf16 %v79_v6, %v77_v36  ;;  %vm1116_vm4 = vweird.f32 %v3435_v25  ;;  %v81_v36 = vld [vmem:[%s4566_s0 + $0x208] sm:$0xff]  ;;  %v83_v6 = vld [vmem:[%s4566_s0 + $0x218] sm:$0xff] }
 0x108   :  { %2007 = vst [vmem:[#allocation2 + $0x40] sm:$0xff] %v1943_v45  ;;  %534 = vmatmul.bf16.gmra.mxu2 %v202_v49  ;;  %v418_v44 = vadd.f32 %v3471_v7, %v3294_v11  ;;  %v205_v58 = vpack.c.bf16 %v139_v53, %v137_v38  ;;  %v498_v2 = vadd.f32 %v3471_v7, %v3357_v27  ;;  %vm1115_vm6 = vweird.f32 %v3335_v15  ;;  %v143_v45 = vld [vmem:[%s4566_s0 + $0x3f8] sm:$0xff] }
 0x109   :  { %v1579_v4 = vadd.f32 %v3395_v55, %v1578_v62  ;;  %v1113_v26 = vmul.f32 %v3435_v25, %v1112_v35  ;;  %v3489_v56 = vadd.f32 %v3286_v22, %v496_v52  ;;  %2132 = vmatmul.msk.bf16.gmra.mxu1 %vm284_vm0, %v175_v41  ;;  %v421_v13 = vadd.f32 %v3471_v7, %v3368_v34  ;;  %vm1117_vm7 = vmor %vm1115_vm6, %vm1116_vm4  ;;  %v671_v39 = vpop.f32.mrf.mxu3 }
 0x10a   :  { %v2304_v46 = vpop.eup %2303  ;;  %v3500_v11 = vadd.f32 %v3151_v37, %v418_v44  ;;  %2147 = vmatmul.msk.bf16.gmra.mxu3 %vm284_vm0, %v205_v58  ;;  %v3504_v22 = vadd.f32 %v3377_v50, %v498_v2  ;;  %v172_v27 = vpack.c.bf16 %v74_v47, %v72_v42  ;;  %vm1120_vm8 = vcmp.eq.f32.partialorder %v1119_v57, 8.507059e+37  ;;  %v76_v47 = vld [vmem:[%s4566_s0 + $0x1e0] sm:$0xff]  ;;  %v78_v44 = vld [vmem:[%s4566_s0 + $0x1f0] sm:$0xff] }
 0x10b   :  { %v1583_v33 = vsel %vm1582_vm5, %v3395_v55, %v1579_v4  ;;  %v1114_v34 = vadd.f32 %v3435_v25, %v1113_v26  ;;  %v3508_v32 = vadd.f32 1.0, %v2304_v46  ;;  %v2191_v9 = vmul.f32 -1.442695, %v3489_v56  ;;  %v3518_v55 = vpop.f32.mrf.mxu1 }
 0x10c   :  { %v2306_v0 = vpop.eup %2305  ;;  %v1588_v15 = vsel %vm3424_vm2, %v1587_v12, %v1583_v33  ;;  %v1122_v37 = vor.u32 1.1754944e-38, %v1121_v28  ;;  %v3516_v50 = vadd.f32 %v3196_v20, %v421_v13  ;;  %459 = vmatmul.bf16.gmra.mxu0 %v172_v27  ;;  %v2160_v16 = vmul.f32 -1.442695, %v3500_v11 }
 0x10d   :  { %v3520_v60 = vpop.f32.mrf.mxu2  ;;  %v1975_v1 = vmul.f32 %v1588_v15, %v3246_v10  ;;  %v1118_v31 = vsel %vm1117_vm7, %v3435_v25, %v1114_v34  ;;  %2307 = vrcp.f32 %v3508_v32  ;;  %v3526_v12 = vadd.f32 1.0, %v2306_v0  ;;  %v3602_v0 = vld [vmem:[%s4566_s0 + $0x3f0] sm:$0xff] }
 0x10e   :  { %v1123_v19 = vsel %vm1120_vm8, %v1122_v37, %v1118_v31  ;;  %v2192_v57 = vmul.f32 -1.442695, %v3504_v22  ;;  %2309 = vpow2.f32 %v2191_v9  ;;  %v2161_v23 = vmul.f32 -1.442695, %v3516_v50  ;;  %v425_v40 = vpop.f32.mrf.mxu0  ;;  %v3597_v9 = vld [vmem:[%s4566_s0 + $0x3e0] sm:$0xff] }
 0x10f   :  { %2039 = vst [vmem:[#allocation2 + $0x140] sm:$0xff] %v1975_v1  ;;  %v1944_v20 = vmul.f32 %v1123_v19, %v3249_v17  ;;  %v501_v10 = vadd.f32 %v3471_v7, %v3450_v24  ;;  %2311 = vrcp.f32 %v3526_v12  ;;  %v1599_v25 = vand.u32 2147483647, %v3508_v32  ;;  %v138_v17 = vld [vmem:[%s4566_s0 + $0x3d0] sm:$0xff] }
 0x110   :  { %v1601_v5 = vand.u32 2147483648, %v3508_v32  ;;  %2313 = vpow2.f32 %v2160_v16  ;;  %v423_v24 = vadd.f32 %v3471_v7, %v3465_v63  ;;  %v1134_v30 = vand.u32 2147483647, %v3526_v12 }
 0x111   :  { %2008 = vst [vmem:[#allocation2 + $0x48] sm:$0xff] %v1944_v20  ;;  %v3542_v28 = vadd.f32 %v669_v14, %v501_v10  ;;  %2315 = vpow2.f32 %v2192_v57  ;;  %v1136_v38 = vand.u32 2147483648, %v3526_v12  ;;  %vm1595_vm9 = vweird.f32 %v3508_v32 }
 0x112   :  { %2317 = vpow2.f32 %v2161_v23  ;;  %v204_v63 = vpack.c.bf16 %v138_v17, %v136_v51  ;;  %v3567_v62 = vadd.f32 %v3244_v3, %v423_v24  ;;  %vm3569_vm10 = vcmp.eq.f32.partialorder %v1599_v25, 8.507059e+37  ;;  %v3635_v24 = vpop.f32.mrf.mxu3 }
 0x113   :  { %v3555_v43 = vpop.eup %2307  ;;  %v2193_v53 = vmul.f32 -1.442695, %v3542_v28  ;;  %v1602_v41 = vor.u32 1.1754944e-38, %v1601_v5  ;;  %vm1130_vm11 = vweird.f32 %v3526_v12  ;;  %v177_v42 = vpack.c.bf16 %v83_v6, %v81_v36  ;;  %v3585_v13 = vpop.f32.mrf.mxu1 }
 0x114   :  { %v1591_v49 = vmul.f32 %v3555_v43, %v3508_v32  ;;  %v2310_v35 = vpop.eup %2309  ;;  %v2162_v4 = vmul.f32 -1.442695, %v3567_v62  ;;  %v207_v26 = vpack.c.bf16 %v143_v45, %v141_v18  ;;  %vm1596_vm12 = vweird.f32 %v3555_v43 }
 0x115   :  { %v505_v58 = vpop.f32.mrf.mxu2  ;;  %v3580_v3 = vpop.eup %2311  ;;  %v3582_v14 = vadd.f32 1.0, %v2310_v35  ;;  %vm3590_vm13 = vcmp.eq.f32.partialorder %v1134_v30, 8.507059e+37  ;;  %v1137_v34 = vor.u32 1.1754944e-38, %v1136_v38  ;;  %2319 = vpow2.f32 %v2193_v53  ;;  %vm1597_vm15 = vmor %vm1595_vm9, %vm1596_vm12 }
 0x116   :  { %v1592_v2 = vsub.f32 1.0, %v1591_v49  ;;  %v2314_v46 = vpop.eup %2313  ;;  %v1126_v27 = vmul.f32 %v3580_v3, %v3526_v12  ;;  %v503_v1 = vadd.f32 %v3471_v7, %v3520_v60  ;;  %v174_v31 = vpack.c.bf16 %v78_v44, %v76_v47  ;;  %v3619_v25 = vpop.f32.mrf.mxu0 }
 0x117   :  { %v2316_v15 = vpop.eup %2315  ;;  %2321 = vrcp.f32 %v3582_v14  ;;  %v3608_v57 = vadd.f32 1.0, %v2314_v46  ;;  %v426_v23 = vadd.f32 %v3471_v7, %v425_v40  ;;  %vm1131_vm14 = vweird.f32 %v3580_v3 }
 0x118   :  { %v1593_v37 = vmul.f32 %v3555_v43, %v1592_v2  ;;  %539 = vmatmul.bf16.gmra.mxu2 %v204_v63  ;;  %v2318_v16 = vpop.eup %2317  ;;  %v1127_v19 = vsub.f32 1.0, %v1126_v27  ;;  %v3610_v20 = vadd.f32 1.0, %v2316_v15  ;;  %2323 = vpow2.f32 %v2162_v4 }
 0x119   :  { %2133 = vmatmul.msk.bf16.gmra.mxu1 %vm284_vm0, %v177_v42  ;;  %v206_v60 = vpack.c.bf16 %v3602_v0, %v3597_v9  ;;  %v1614_v40 = vand.u32 2147483647, %v3582_v14  ;;  %v1616_v51 = vand.u32 2147483648, %v3582_v14  ;;  %2325 = vrcp.f32 %v3608_v57 }
 0x11a   :  { %v1594_v10 = vadd.f32 %v3555_v43, %v1593_v37  ;;  %2148 = vmatmul.msk.bf16.gmra.mxu3 %vm284_vm0, %v207_v26  ;;  %v1128_v5 = vmul.f32 %v3580_v3, %v1127_v19  ;;  %2327 = vrcp.f32 %v3610_v20  ;;  %v3631_v36 = vadd.f32 1.0, %v2318_v16  ;;  %vm1132_vm0 = vmor %vm1130_vm11, %vm1131_vm14 }
 0x11b   :  { %v3633_v6 = vadd.f32 %v671_v39, %v503_v1  ;;  %v2320_v32 = vpop.eup %2319  ;;  %v1151_v38 = vand.u32 2147483648, %v3608_v57  ;;  %v3642_v53 = vadd.f32 %v3277_v59, %v426_v23  ;;  %vm1610_vm1 = vweird.f32 %v3582_v14  ;;  %v3668_v44 = vpop.f32.mrf.mxu1 }
 0x11c   :  { %v1598_v17 = vsel %vm1597_vm15, %v3555_v43, %v1594_v10  ;;  %464 = vmatmul.bf16.gmra.mxu0 %v174_v31  ;;  %v1129_v30 = vadd.f32 %v3580_v3, %v1128_v5  ;;  %v1149_v39 = vand.u32 2147483647, %v3608_v57  ;;  %v3652_v49 = vadd.f32 %v3471_v7, %v505_v58 }
 0x11d   :  { %v1603_v18 = vsel %vm3569_vm10, %v1602_v41, %v1598_v17  ;;  %v2322_v43 = vpop.eup %2321  ;;  %vm3656_vm2 = vcmp.eq.f32.partialorder %v1614_v40, 8.507059e+37  ;;  %v1629_v52 = vand.u32 2147483647, %v3610_v20  ;;  %v3661_v12 = vpop.f32.mrf.mxu2  ;;  %vm1145_vm3 = vweird.f32 %v3608_v57 }
 0x11e   :  { %v1976_v45 = vmul.f32 %v1603_v18, %v3355_v48  ;;  %v1133_v63 = vsel %vm1132_vm0, %v3580_v3, %v1129_v30  ;;  %v1606_v59 = vmul.f32 %v2322_v43, %v3582_v14  ;;  %v1617_v48 = vor.u32 1.1754944e-38, %v1616_v51  ;;  %v2324_v41 = vpop.eup %2323  ;;  %v3689_v23 = vpop.f32.mrf.mxu0 }
 0x11f   :  { %v1138_v42 = vsel %vm3590_vm13, %v1137_v34, %v1133_v63  ;;  %v1631_v47 = vand.u32 2147483648, %v3610_v20  ;;  %2329 = vrcp.f32 %v3631_v36  ;;  %v2326_v58 = vpop.eup %2325  ;;  %v1152_v4 = vor.u32 1.1754944e-38, %v1151_v38 }
 0x120   :  { %2040 = vst [vmem:[#allocation2 + $0x148] sm:$0xff] %v1976_v45  ;;  %v1945_v3 = vmul.f32 %v1138_v42, %v3366_v29  ;;  %v1607_v2 = vsub.f32 1.0, %v1606_v59  ;;  %vm1625_vm4 = vweird.f32 %v3610_v20  ;;  %v2328_v26 = vpop.eup %2327  ;;  %vm1611_vm5 = vweird.f32 %v2322_v43 }
 0x121   :  { %v1141_v46 = vmul.f32 %v2326_v58, %v3608_v57  ;;  %vm3673_vm6 = vcmp.eq.f32.partialorder %v1149_v39, 8.507059e+37  ;;  %v3677_v33 = vadd.f32 1.0, %v2320_v32  ;;  %v3679_v34 = vadd.f32 1.0, %v2324_v41  ;;  %vm1612_vm10 = vmor %vm1610_vm1, %vm1611_vm5  ;;  %v3697_v32 = vpop.f32.mrf.mxu3 }
 0x122   :  { %2009 = vst [vmem:[#allocation2 + $0x50] sm:$0xff] %v1945_v3  ;;  %v1608_v15 = vmul.f32 %v2322_v43, %v1607_v2  ;;  %v1621_v29 = vmul.f32 %v2328_v26, %v3610_v20  ;;  %vm3682_vm7 = vcmp.eq.f32.partialorder %v1629_v52, 8.507059e+37  ;;  %v1164_v1 = vand.u32 2147483647, %v3631_v36 }
 0x123   :  { %v1142_v31 = vsub.f32 1.0, %v1141_v46  ;;  %v1632_v16 = vor.u32 1.1754944e-38, %v1631_v47  ;;  %v1166_v19 = vand.u32 2147483648, %v3631_v36  ;;  %2331 = vrcp.f32 %v3677_v33 }
 0x124   :  { %v1609_v10 = vadd.f32 %v2322_v43, %v1608_v15  ;;  %vm1146_vm8 = vweird.f32 %v2326_v58  ;;  %v1622_v5 = vsub.f32 1.0, %v1621_v29  ;;  %vm1160_vm9 = vweird.f32 %v3631_v36 }
 0x125   :  { %v2330_v40 = vpop.eup %2329  ;;  %v1143_v51 = vmul.f32 %v2326_v58, %v1142_v31  ;;  %vm1626_vm11 = vweird.f32 %v2328_v26  ;;  %v1646_v17 = vand.u32 2147483648, %v3677_v33  ;;  %2333 = vrcp.f32 %v3679_v34  ;;  %vm1147_vm13 = vmor %vm1145_vm3, %vm1146_vm8  ;;  %v510_v35 = vpop.f32.mrf.mxu2 }
 0x126   :  { %v1613_v18 = vsel %vm1612_vm10, %v2322_v43, %v1609_v10  ;;  %v1623_v30 = vmul.f32 %v2328_v26, %v1622_v5  ;;  %v1156_v38 = vmul.f32 %v2330_v40, %v3631_v36  ;;  %vm3700_vm12 = vcmp.eq.f32.partialorder %v1164_v1, 8.507059e+37  ;;  %vm1627_vm0 = vmor %vm1625_vm4, %vm1626_vm11 }
 0x127   :  { %v1644_v39 = vand.u32 2147483647, %v3677_v33  ;;  %v1618_v14 = vsel %vm3656_vm2, %v1617_v48, %v1613_v18  ;;  %v1144_v63 = vadd.f32 %v2326_v58, %v1143_v51  ;;  %v1167_v59 = vor.u32 1.1754944e-38, %v1166_v19 }
 0x128   :  { %v1179_v52 = vand.u32 2147483647, %v3679_v34  ;;  %544 = vmatmul.bf16.gmra.mxu2 %v206_v60  ;;  %v1977_v43 = vmul.f32 %v1618_v14, %v3489_v56  ;;  %v1624_v41 = vadd.f32 %v2328_v26, %v1623_v30  ;;  %v1157_v42 = vsub.f32 1.0, %v1156_v38  ;;  %v3721_v60 = vpop.f32.mrf.mxu1 }
 0x129   :  { %vm1161_vm14 = vweird.f32 %v2330_v40  ;;  %vm1640_vm15 = vweird.f32 %v3677_v33  ;;  %v2332_v48 = vpop.eup %2331  ;;  %v1148_v47 = vsel %vm1147_vm13, %v2326_v58, %v1144_v63  ;;  %v1647_v9 = vor.u32 1.1754944e-38, %v1646_v17 }
 0x12a   :  { %v2194_v0 = vmul.f32 -1.442695, %v3633_v6  ;;  %v2163_v56 = vmul.f32 -1.442695, %v3642_v53  ;;  %2041 = vst [vmem:[#allocation2 + $0x150] sm:$0xff] %v1977_v43  ;;  %v1153_v57 = vsel %vm3673_vm6, %v1152_v4, %v1148_v47  ;;  %v1628_v3 = vsel %vm1627_vm0, %v2328_v26, %v1624_v41  ;;  %vm1162_vm4 = vmor %vm1160_vm9, %vm1161_vm14 }
 0x12b   :  { %v1158_v2 = vmul.f32 %v2330_v40, %v1157_v42  ;;  %v1636_v46 = vmul.f32 %v2332_v48, %v3677_v33  ;;  %vm3726_vm1 = vcmp.eq.f32.partialorder %v1644_v39, 8.507059e+37  ;;  %vm1175_vm2 = vweird.f32 %v3679_v34  ;;  %v2334_v20 = vpop.eup %2333 }
 0x12c   :  { %v1946_v15 = vmul.f32 %v1153_v57, %v3500_v11  ;;  %v1633_v29 = vsel %vm3682_vm7, %v1632_v16, %v1628_v3  ;;  %vm1641_vm3 = vweird.f32 %v2332_v48  ;;  %v1181_v27 = vand.u32 2147483648, %v3679_v34  ;;  %v432_v16 = vpop.f32.mrf.mxu0 }
 0x12d   :  { %v1978_v4 = vmul.f32 %v1633_v29, %v3504_v22  ;;  %v1159_v26 = vadd.f32 %v2330_v40, %v1158_v2  ;;  %v1637_v1 = vsub.f32 1.0, %v1636_v46  ;;  %v1171_v31 = vmul.f32 %v2334_v20, %v3679_v34  ;;  %vm1642_vm6 = vmor %vm1640_vm15, %vm1641_vm3 }
 0x12e   :  { %2010 = vst [vmem:[#allocation2 + $0x58] sm:$0xff] %v1946_v15  ;;  %vm1176_vm5 = vweird.f32 %v2334_v20  ;;  %2335 = vpow2.f32 %v2194_v0  ;;  %v3742_v11 = vadd.f32 %v3635_v24, %v3652_v49  ;;  %v428_v37 = vadd.f32 %v3471_v7, %v3619_v25  ;;  %v679_v49 = vpop.f32.mrf.mxu3 }
 0x12f   :  { %2042 = vst [vmem:[#allocation2 + $0x158] sm:$0xff] %v1978_v4  ;;  %v1163_v22 = vsel %vm1162_vm4, %v2330_v40, %v1159_v26  ;;  %v1638_v19 = vmul.f32 %v2332_v48, %v1637_v1  ;;  %v1172_v10 = vsub.f32 1.0, %v1171_v31  ;;  %2337 = vpow2.f32 %v2163_v56  ;;  %vm1177_vm8 = vmor %vm1175_vm2, %vm1176_vm5 }
 0x130   :  { %v1168_v5 = vsel %vm3700_vm12, %v1167_v59, %v1163_v22  ;;  %v2195_v36 = vmul.f32 -1.442695, %v3742_v11  ;;  %v3750_v51 = vadd.f32 %v3337_v54, %v428_v37  ;;  %v508_v24 = vadd.f32 %v3471_v7, %v3661_v12  ;;  %v3774_v63 = vpop.f32.mrf.mxu1 }
 0x131   :  { %v1947_v25 = vmul.f32 %v1168_v5, %v3516_v50  ;;  %v1639_v17 = vadd.f32 %v2332_v48, %v1638_v19  ;;  %v1173_v18 = vmul.f32 %v2334_v20, %v1172_v10  ;;  %v431_v40 = vadd.f32 %v3471_v7, %v3689_v23  ;;  %v512_v23 = vpop.f32.mrf.mxu2 }
 0x132   :  { %2339 = vpow2.f32 %v2195_v36  ;;  %v2164_v30 = vmul.f32 -1.442695, %v3750_v51  ;;  %v3762_v54 = vadd.f32 %v3697_v32, %v508_v24  ;;  %v511_v12 = vadd.f32 %v3471_v7, %v510_v35 }
 0x133   :  { %2011 = vst [vmem:[#allocation2 + $0x60] sm:$0xff] %v1947_v25  ;;  %v1643_v38 = vsel %vm1642_vm6, %v2332_v48, %v1639_v17  ;;  %v1174_v50 = vadd.f32 %v2334_v20, %v1173_v18  ;;  %vm1180_vm7 = vcmp.eq.f32.partialorder %v1179_v52, 8.507059e+37  ;;  %v3766_v45 = vadd.f32 %v3409_v61, %v431_v40 }
 0x134   :  { %v2336_v39 = vpop.eup %2335  ;;  %v1648_v33 = vsel %vm3726_vm1, %v1647_v9, %v1643_v38  ;;  %v1182_v32 = vor.u32 1.1754944e-38, %v1181_v27  ;;  %2341 = vpow2.f32 %v2164_v30  ;;  %v2196_v14 = vmul.f32 -1.442695, %v3762_v54 }
 0x135   :  { %v2338_v59 = vpop.eup %2337  ;;  %v1979_v52 = vmul.f32 %v1648_v33, %v3542_v28  ;;  %v1178_v61 = vsel %vm1177_vm8, %v2334_v20, %v1174_v50  ;;  %v3777_v43 = vadd.f32 1.0, %v2336_v39  ;;  %v3779_v41 = vadd.f32 %v679_v49, %v511_v12  ;;  %v435_v28 = vpop.f32.mrf.mxu0 }
 0x136   :  { %v1183_v42 = vsel %vm1180_vm7, %v1182_v32, %v1178_v61  ;;  %v3781_v35 = vadd.f32 1.0, %v2338_v59  ;;  %2343 = vpow2.f32 %v2196_v14  ;;  %v2165_v34 = vmul.f32 -1.442695, %v3766_v45 }
 0x137   :  { %2043 = vst [vmem:[#allocation2 + $0x160] sm:$0xff] %v1979_v52  ;;  %v1948_v48 = vmul.f32 %v1183_v42, %v3567_v62  ;;  %2345 = vrcp.f32 %v3777_v43  ;;  %v433_v47 = vadd.f32 %v3471_v7, %v432_v16  ;;  %v2197_v56 = vmul.f32 -1.442695, %v3779_v41  ;;  %v3793_v62 = vpop.f32.mrf.mxu3 }
 0x138   :  { %v2340_v9 = vpop.eup %2339  ;;  %2347 = vrcp.f32 %v3781_v35  ;;  %v1659_v3 = vand.u32 2147483647, %v3777_v43  ;;  %v1661_v2 = vand.u32 2147483648, %v3777_v43  ;;  %v1194_v46 = vand.u32 2147483647, %v3781_v35  ;;  %v3815_v19 = vpop.f32.mrf.mxu1 }
 0x139   :  { %2012 = vst [vmem:[#allocation2 + $0x68] sm:$0xff] %v1948_v48  ;;  %v3788_v0 = vadd.f32 1.0, %v2340_v9  ;;  %2349 = vpow2.f32 %v2165_v34  ;;  %v1196_v58 = vand.u32 2147483648, %v3781_v35  ;;  %v3799_v20 = vadd.f32 %v3518_v55, %v433_v47  ;;  %v515_v1 = vpop.f32.mrf.mxu2 }
 0x13a   :  { %v2342_v57 = vpop.eup %2341  ;;  %vm1655_vm9 = vweird.f32 %v3777_v43  ;;  %vm1190_vm10 = vweird.f32 %v3781_v35  ;;  %vm3809_vm11 = vcmp.eq.f32.partialorder %v1659_v3, 8.507059e+37  ;;  %v1662_v16 = vor.u32 1.1754944e-38, %v1661_v2 }
 0x13b   :  { %2351 = vrcp.f32 %v3788_v0  ;;  %v3802_v29 = vadd.f32 1.0, %v2342_v57  ;;  %v1676_v4 = vand.u32 2147483648, %v3788_v0  ;;  %v1674_v22 = vand.u32 2147483647, %v3788_v0 }
 0x13c   :  { %v2344_v15 = vpop.eup %2343  ;;  %2353 = vpow2.f32 %v2197_v56  ;;  %vm3818_vm12 = vcmp.eq.f32.partialorder %v1194_v46, 8.507059e+37  ;;  %v1197_v36 = vor.u32 1.1754944e-38, %v1196_v58  ;;  %v2166_v24 = vmul.f32 -1.442695, %v3799_v20 }
 0x13d   :  { %v2346_v27 = vpop.eup %2345  ;;  %v3806_v26 = vadd.f32 1.0, %v2344_v15  ;;  %2355 = vrcp.f32 %v3802_v29  ;;  %v3824_v49 = vadd.f32 %v3471_v7, %v512_v23  ;;  %vm1670_vm13 = vweird.f32 %v3788_v0  ;;  %v3841_v14 = vpop.f32.mrf.mxu0 }
 0x13e   :  { %v2348_v31 = vpop.eup %2347  ;;  %v1651_v37 = vmul.f32 %v2346_v27, %v3777_v43  ;;  %v3829_v18 = vadd.f32 %v3471_v7, %v435_v28  ;;  %v3832_v40 = vadd.f32 %v3471_v7, %v515_v1  ;;  %vm1656_vm14 = vweird.f32 %v2346_v27 }
 0x13f   :  { %v1186_v10 = vmul.f32 %v2348_v31, %v3781_v35  ;;  %v2350_v25 = vpop.eup %2349  ;;  %2357 = vrcp.f32 %v3806_v26  ;;  %v1677_v38 = vor.u32 1.1754944e-38, %v1676_v4  ;;  %v1209_v50 = vand.u32 2147483647, %v3802_v29  ;;  %v3848_v28 = vpop.f32.mrf.mxu3  ;;  %vm1657_vm2 = vmor %vm1655_vm9, %vm1656_vm14 }
 0x140   :  { %v1652_v17 = vsub.f32 1.0, %v1651_v37  ;;  %vm1191_vm15 = vweird.f32 %v2348_v31  ;;  %vm3836_vm0 = vcmp.eq.f32.partialorder %v1674_v22, 8.507059e+37  ;;  %v1211_v32 = vand.u32 2147483648, %v3802_v29 }
 0x141   :  { %v2352_v30 = vpop.eup %2351  ;;  %v1187_v12 = vsub.f32 1.0, %v1186_v10  ;;  %vm1205_vm1 = vweird.f32 %v3802_v29  ;;  %v1689_v61 = vand.u32 2147483647, %v3806_v26  ;;  %v3845_v42 = vadd.f32 1.0, %v2350_v25  ;;  %vm1192_vm6 = vmor %vm1190_vm10, %vm1191_vm15  ;;  %v3868_v10 = vpop.f32.mrf.mxu2 }
 0x142   :  { %v1653_v23 = vmul.f32 %v2346_v27, %v1652_v17  ;;  %v1666_v39 = vmul.f32 %v2352_v30, %v3788_v0  ;;  %v2354_v59 = vpop.eup %2353  ;;  %v1691_v9 = vand.u32 2147483648, %v3806_v26  ;;  %2359 = vpow2.f32 %v2166_v24  ;;  %v3874_v17 = vpop.f32.mrf.mxu1 }
 0x143   :  { %v1188_v52 = vmul.f32 %v2348_v31, %v1187_v12  ;;  %v2356_v34 = vpop.eup %2355  ;;  %vm1671_vm3 = vweird.f32 %v2352_v30  ;;  %vm3854_vm4 = vcmp.eq.f32.partialorder %v1209_v50, 8.507059e+37  ;;  %vm1685_vm5 = vweird.f32 %v3806_v26 }
 0x144   :  { %v1654_v48 = vadd.f32 %v2346_v27, %v1653_v23  ;;  %v1667_v47 = vsub.f32 1.0, %v1666_v39  ;;  %v1201_v57 = vmul.f32 %v2356_v34, %v3802_v29  ;;  %2361 = vrcp.f32 %v3845_v42  ;;  %vm1672_vm7 = vmor %vm1670_vm13, %vm1671_vm3 }
 0x145   :  { %v1189_v56 = vadd.f32 %v2348_v31, %v1188_v52  ;;  %v2358_v2 = vpop.eup %2357  ;;  %v1212_v58 = vor.u32 1.1754944e-38, %v1211_v32  ;;  %v3863_v15 = vadd.f32 1.0, %v2354_v59  ;;  %v1224_v25 = vand.u32 2147483647, %v3845_v42  ;;  %v440_v59 = vpop.f32.mrf.mxu0 }
 0x146   :  { %v1658_v46 = vsel %vm1657_vm2, %v2346_v27, %v1654_v48  ;;  %v1668_v43 = vmul.f32 %v2352_v30, %v1667_v47  ;;  %v1202_v37 = vsub.f32 1.0, %v1201_v57  ;;  %v1681_v22 = vmul.f32 %v2358_v2, %v3806_v26 }
 0x147   :  { %v1663_v4 = vsel %vm3809_vm11, %v1662_v16, %v1658_v46  ;;  %v1193_v1 = vsel %vm1192_vm6, %v2348_v31, %v1189_v56  ;;  %vm1206_vm8 = vweird.f32 %v2356_v34  ;;  %vm3880_vm9 = vcmp.eq.f32.partialorder %v1689_v61, 8.507059e+37 }
 0x148   :  { %v1980_v24 = vmul.f32 %v1663_v4, %v3633_v6  ;;  %v1198_v27 = vsel %vm3818_vm12, %v1197_v36, %v1193_v1  ;;  %v1669_v35 = vadd.f32 %v2352_v30, %v1668_v43  ;;  %v1203_v31 = vmul.f32 %v2356_v34, %v1202_v37  ;;  %v2360_v16 = vpop.eup %2359  ;;  %vm1207_vm11 = vmor %vm1205_vm1, %vm1206_vm8 }
 0x149   :  { %v1949_v12 = vmul.f32 %v1198_v27, %v3642_v53  ;;  %v1682_v55 = vsub.f32 1.0, %v1681_v22  ;;  %v1692_v36 = vor.u32 1.1754944e-38, %v1691_v9  ;;  %2363 = vrcp.f32 %v3863_v15 }
 0x14a   :  { %2044 = vst [vmem:[#allocation2 + $0x168] sm:$0xff] %v1980_v24  ;;  %v1673_v6 = vsel %vm1672_vm7, %v2352_v30, %v1669_v35  ;;  %v2362_v50 = vpop.eup %2361  ;;  %v1204_v0 = vadd.f32 %v2356_v34, %v1203_v31  ;;  %vm1686_vm10 = vweird.f32 %v2358_v2  ;;  %vm1220_vm12 = vweird.f32 %v3845_v42  ;;  %v3927_v1 = vpop.f32.mrf.mxu1 }
 0x14b   :  { %2013 = vst [vmem:[#allocation2 + $0x70] sm:$0xff] %v1949_v12  ;;  %v1678_v53 = vsel %vm3836_vm0, %v1677_v38, %v1673_v6  ;;  %v1683_v23 = vmul.f32 %v2358_v2, %v1682_v55  ;;  %v1216_v30 = vmul.f32 %v2362_v50, %v3845_v42  ;;  %vm3893_vm13 = vcmp.eq.f32.partialorder %v1224_v25, 8.507059e+37  ;;  %vm1687_vm14 = vmor %vm1685_vm5, %vm1686_vm10 }
 0x14c   :  { %v1981_v39 = vmul.f32 %v1678_v53, %v3742_v11  ;;  %v1208_v33 = vsel %vm1207_vm11, %v2356_v34, %v1204_v0  ;;  %v1226_v52 = vand.u32 2147483648, %v3845_v42  ;;  %v1704_v61 = vand.u32 2147483647, %v3863_v15  ;;  %v686_v34 = vpop.f32.mrf.mxu3 }
 0x14d   :  { %v1684_v38 = vadd.f32 %v2358_v2, %v1683_v23  ;;  %v1213_v11 = vsel %vm3854_vm4, %v1212_v58, %v1208_v33  ;;  %v1217_v29 = vsub.f32 1.0, %v1216_v30  ;;  %v3903_v48 = vadd.f32 1.0, %v2360_v16  ;;  %v442_v16 = vpop.f32.mrf.mxu0 }
 0x14e   :  { %2045 = vst [vmem:[#allocation2 + $0x170] sm:$0xff] %v1981_v39  ;;  %v3907_v47 = vadd.f32 %v3793_v62, %v3824_v49  ;;  %v1950_v9 = vmul.f32 %v1213_v11, %v3750_v51  ;;  %v1706_v57 = vand.u32 2147483648, %v3863_v15  ;;  %v3913_v3 = vadd.f32 %v3585_v13, %v3829_v18 }
 0x14f   :  { %v1688_v56 = vsel %vm1687_vm14, %v2358_v2, %v1684_v38  ;;  %v2364_v46 = vpop.eup %2363  ;;  %v1218_v43 = vmul.f32 %v2362_v50, %v1217_v29  ;;  %vm1221_vm15 = vweird.f32 %v2362_v50  ;;  %2365 = vrcp.f32 %v3903_v48  ;;  %v520_v2 = vpop.f32.mrf.mxu2 }
 0x150   :  { %v1693_v26 = vsel %vm3880_vm9, %v1692_v36, %v1688_v56  ;;  %2014 = vst [vmem:[#allocation2 + $0x78] sm:$0xff] %v1950_v9  ;;  %v1227_v49 = vor.u32 1.1754944e-38, %v1226_v52  ;;  %v1696_v51 = vmul.f32 %v2364_v46, %v3863_v15  ;;  %vm1700_vm0 = vweird.f32 %v3863_v15  ;;  %vm1222_vm2 = vmor %vm1220_vm12, %vm1221_vm15 }
 0x151   :  { %v1982_v62 = vmul.f32 %v1693_v26, %v3762_v54  ;;  %v1219_v58 = vadd.f32 %v2362_v50, %v1218_v43  ;;  %vm3921_vm1 = vcmp.eq.f32.partialorder %v1704_v61, 8.507059e+37  ;;  %v2198_v18 = vmul.f32 -1.442695, %v3907_v47 }
 0x152   :  { %v2167_v4 = vmul.f32 -1.442695, %v3913_v3  ;;  %v1697_v54 = vsub.f32 1.0, %v1696_v51  ;;  %v1707_v37 = vor.u32 1.1754944e-38, %v1706_v57  ;;  %v3933_v22 = vadd.f32 %v3848_v28, %v3832_v40  ;;  %v3971_v29 = vpop.f32.mrf.mxu1 }
 0x153   :  { %2046 = vst [vmem:[#allocation2 + $0x178] sm:$0xff] %v1982_v62  ;;  %v438_v24 = vadd.f32 %v3471_v7, %v3841_v14  ;;  %v1223_v27 = vsel %vm1222_vm2, %v2362_v50, %v1219_v58  ;;  %vm1701_vm3 = vweird.f32 %v2364_v46  ;;  %2367 = vpow2.f32 %v2198_v18 }
 0x154   :  { %v518_v35 = vadd.f32 %v3471_v7, %v3868_v10  ;;  %v1228_v25 = vsel %vm3893_vm13, %v1227_v49, %v1223_v27  ;;  %v1698_v42 = vmul.f32 %v2364_v46, %v1697_v54  ;;  %2369 = vpow2.f32 %v2167_v4  ;;  %vm1702_vm4 = vmor %vm1700_vm0, %vm1701_vm3  ;;  %v689_v50 = vpop.f32.mrf.mxu3 }
 0x155   :  { %v2199_v12 = vmul.f32 -1.442695, %v3933_v22  ;;  %v2366_v31 = vpop.eup %2365  ;;  %v1951_v40 = vmul.f32 %v1228_v25, %v3766_v45  ;;  %v3944_v28 = vadd.f32 %v3668_v44, %v438_v24  ;;  %v441_v55 = vadd.f32 %v3471_v7, %v440_v59 }
 0x156   :  { %v3946_v14 = vadd.f32 %v686_v34, %v518_v35  ;;  %v1699_v6 = vadd.f32 %v2364_v46, %v1698_v42  ;;  %v1231_v10 = vmul.f32 %v2366_v31, %v3903_v48  ;;  %v1239_v5 = vand.u32 2147483647, %v3903_v48 }
 0x157   :  { %2371 = vpow2.f32 %v2199_v12  ;;  %2015 = vst [vmem:[#allocation2 + $0x80] sm:$0xff] %v1951_v40  ;;  %v2168_v45 = vmul.f32 -1.442695, %v3944_v28  ;;  %v3957_v36 = vadd.f32 %v3721_v60, %v441_v55  ;;  %v521_v53 = vadd.f32 %v3471_v7, %v520_v2  ;;  %v522_v61 = vpop.f32.mrf.mxu2  ;;  %v445_v2 = vpop.f32.mrf.mxu0 }
 0x158   :  { %v2200_v44 = vmul.f32 -1.442695, %v3946_v14  ;;  %v1703_v0 = vsel %vm1702_vm4, %v2364_v46, %v1699_v6  ;;  %v1232_v23 = vsub.f32 1.0, %v1231_v10  ;;  %vm1236_vm5 = vweird.f32 %v2366_v31 }
 0x159   :  { %v1241_v39 = vand.u32 2147483648, %v3903_v48  ;;  %v2368_v30 = vpop.eup %2367  ;;  %v1708_v15 = vsel %vm3921_vm1, %v1707_v37, %v1703_v0  ;;  %2373 = vpow2.f32 %v2168_v45  ;;  %v2169_v32 = vmul.f32 -1.442695, %v3957_v36 }
 0x15a   :  { %v3964_v59 = vadd.f32 %v689_v50, %v521_v53  ;;  %v2370_v33 = vpop.eup %2369  ;;  %v1983_v60 = vmul.f32 %v1708_v15, %v3779_v41  ;;  %v1233_v38 = vmul.f32 %v2366_v31, %v1232_v23  ;;  %v3967_v52 = vadd.f32 1.0, %v2368_v30  ;;  %v4021_v50 = vpop.f32.mrf.mxu1 }
 0x15b   :  { %2375 = vpow2.f32 %v2200_v44  ;;  %v3969_v11 = vadd.f32 1.0, %v2370_v33  ;;  %vm1235_vm6 = vweird.f32 %v3903_v48  ;;  %v1242_v41 = vor.u32 1.1754944e-38, %v1241_v39  ;;  %v4027_v39 = vld [vmem:[%s4568_s2] ss:$0 sm:$0xff] }
 0x15c   :  { %2377 = vpow2.f32 %v2169_v32  ;;  %2047 = vst [vmem:[#allocation2 + $0x180] sm:$0xff] %v1983_v60  ;;  %v1234_v9 = vadd.f32 %v2366_v31, %v1233_v38  ;;  %vm1237_vm7 = vmor %vm1235_vm6, %vm1236_vm5  ;;  %v443_v56 = vadd.f32 %v3471_v7, %v442_v16  ;;  %vm1240_vm8 = vcmp.eq.f32.partialorder %v1239_v5, 8.507059e+37  ;;  %v691_v27 = vpop.f32.mrf.mxu3 }
 0x15d   :  { %v2372_v34 = vpop.eup %2371  ;;  %2379 = vrcp.f32 %v3967_v52  ;;  %v2201_v26 = vmul.f32 -1.442695, %v3964_v59  ;;  %v1719_v49 = vand.u32 2147483647, %v3967_v52  ;;  %v1721_v48 = vand.u32 2147483648, %v3967_v52 }
 0x15e   :  { %2381 = vrcp.f32 %v3969_v11  ;;  %v1238_v57 = vsel %vm1237_vm7, %v2366_v31, %v1234_v9  ;;  %v3978_v46 = vadd.f32 1.0, %v2372_v34  ;;  %v1256_v51 = vand.u32 2147483648, %v3969_v11 }
 0x15f   :  { %v2374_v43 = vpop.eup %2373  ;;  %v1243_v62 = vsel %vm1240_vm8, %v1242_v41, %v1238_v57  ;;  %v1254_v18 = vand.u32 2147483647, %v3969_v11  ;;  %v3992_v24 = vadd.f32 %v3774_v63, %v443_v56  ;;  %v523_v35 = vadd.f32 %v3471_v7, %v522_v61  ;;  %v4012_v10 = vpop.f32.mrf.mxu2 }
 0x160   :  { %v1952_v13 = vmul.f32 %v1243_v62, %v3799_v20  ;;  %2383 = vrcp.f32 %v3978_v46  ;;  %v3987_v54 = vadd.f32 1.0, %v2374_v43  ;;  %vm1715_vm9 = vweird.f32 %v3967_v52  ;;  %v4041_v57 = vpop.f32.mrf.mxu0 }
 0x161   :  { %v2376_v58 = vpop.eup %2375  ;;  %vm1250_vm10 = vweird.f32 %v3969_v11  ;;  %2385 = vpow2.f32 %v2201_v26  ;;  %vm3998_vm11 = vcmp.eq.f32.partialorder %v1719_v49, 8.507059e+37  ;;  %v1722_v31 = vor.u32 1.1754944e-38, %v1721_v48 }
 0x162   :  { %v2378_v4 = vpop.eup %2377  ;;  %v3989_v37 = vadd.f32 1.0, %v2376_v58  ;;  %2016 = vst [vmem:[#allocation2 + $0x88] sm:$0xff] %v1952_v13  ;;  %v1257_v63 = vor.u32 1.1754944e-38, %v1256_v51  ;;  %v1734_v40 = vand.u32 2147483647, %v3978_v46  ;;  %vm4004_vm12 = vcmp.eq.f32.partialorder %v1254_v18, 8.507059e+37 }
 0x163   :  { %v2380_v25 = vpop.eup %2379  ;;  %v1736_v16 = vand.u32 2147483648, %v3978_v46  ;;  %2387 = vrcp.f32 %v3987_v54  ;;  %v4010_v6 = vadd.f32 1.0, %v2378_v4  ;;  %vm1730_vm13 = vweird.f32 %v3978_v46 }
 0x164   :  { %v2382_v20 = vpop.eup %2381  ;;  %v1711_v42 = vmul.f32 %v2380_v25, %v3967_v52  ;;  %2389 = vrcp.f32 %v3989_v37  ;;  %v4017_v45 = vmul.f32 -1.442695, %v3992_v24  ;;  %v4019_v44 = vadd.f32 %v691_v27, %v523_v35  ;;  %v694_v18 = vpop.f32.mrf.mxu3 }
 0x165   :  { %v1246_v7 = vmul.f32 %v2382_v20, %v3969_v11  ;;  %vm1716_vm14 = vweird.f32 %v2380_v25  ;;  %v1271_v23 = vand.u32 2147483648, %v3987_v54  ;;  %v4030_v30 = vadd.f32 %v4027_v39, %v445_v2 }
 0x166   :  { %v1712_v5 = vsub.f32 1.0, %v1711_v42  ;;  %v2384_v53 = vpop.eup %2383  ;;  %vm4033_vm15 = vcmp.eq.f32.partialorder %v1734_v40, 8.507059e+37  ;;  %v1269_v60 = vand.u32 2147483647, %v3987_v54  ;;  %vm1251_vm0 = vweird.f32 %v2382_v20  ;;  %vm1717_vm2 = vmor %vm1715_vm9, %vm1716_vm14 }
 0x167   :  { %v1247_v0 = vsub.f32 1.0, %v1246_v7  ;;  %v1726_v32 = vmul.f32 %v2384_v53, %v3978_v46  ;;  %v2386_v38 = vpop.eup %2385  ;;  %v1737_v34 = vor.u32 1.1754944e-38, %v1736_v16  ;;  %v1749_v9 = vand.u32 2147483647, %v3989_v37  ;;  %vm1252_vm5 = vmor %vm1250_vm10, %vm1251_vm0 }
 0x168   :  { %v1713_v15 = vmul.f32 %v2380_v25, %v1712_v5  ;;  %vm1265_vm1 = vweird.f32 %v3987_v54  ;;  %2391 = vrcp.f32 %v4010_v6  ;;  %vm1731_vm3 = vweird.f32 %v2384_v53 }
 0x169   :  { %v1248_v61 = vmul.f32 %v2382_v20, %v1247_v0  ;;  %v1727_v56 = vsub.f32 1.0, %v1726_v32  ;;  %v2388_v26 = vpop.eup %2387  ;;  %v1272_v62 = vor.u32 1.1754944e-38, %v1271_v23  ;;  %vm1745_vm4 = vweird.f32 %v3989_v37  ;;  %vm1732_vm8 = vmor %vm1730_vm13, %vm1731_vm3  ;;  %v527_v0 = vpop.f32.mrf.mxu2 }
 0x16a   :  { %v1714_v41 = vadd.f32 %v2380_v25, %v1713_v15  ;;  %v1751_v49 = vand.u32 2147483648, %v3989_v37  ;;  %v2390_v48 = vpop.eup %2389  ;;  %v1261_v58 = vmul.f32 %v2388_v26, %v3987_v54  ;;  %vm4052_vm6 = vcmp.eq.f32.partialorder %v1269_v60, 8.507059e+37 }
 0x16b   :  { %v1249_v43 = vadd.f32 %v2382_v20, %v1248_v61  ;;  %v1728_v2 = vmul.f32 %v2384_v53, %v1727_v56  ;;  %v4056_v52 = vadd.f32 1.0, %v2386_v38  ;;  %v1741_v35 = vmul.f32 %v2390_v48, %v3989_v37 }
 0x16c   :  { %v1718_v51 = vsel %vm1717_vm2, %v2380_v25, %v1714_v41  ;;  %vm4061_vm7 = vcmp.eq.f32.partialorder %v1749_v9, 8.507059e+37  ;;  %v1284_v11 = vand.u32 2147483647, %v4010_v6  ;;  %v1262_v16 = vsub.f32 1.0, %v1261_v58  ;;  %v450_v41 = vpop.f32.mrf.mxu0 }
 0x16d   :  { %v1723_v4 = vsel %vm3998_vm11, %v1722_v31, %v1718_v51  ;;  %v1253_v27 = vsel %vm1252_vm5, %v2382_v20, %v1249_v43  ;;  %v1729_v7 = vadd.f32 %v2384_v53, %v1728_v2  ;;  %v1742_v20 = vsub.f32 1.0, %v1741_v35 }
 0x16e   :  { %v1984_v42 = vmul.f32 %v1723_v4, %v3907_v47  ;;  %v1258_v40 = vsel %vm4004_vm12, %v1257_v63, %v1253_v27  ;;  %v1752_v12 = vor.u32 1.1754944e-38, %v1751_v49  ;;  %v1286_v31 = vand.u32 2147483648, %v4010_v6  ;;  %v2392_v23 = vpop.eup %2391  ;;  %v4075_v63 = vpop.f32.mrf.mxu1 }
 0x16f   :  { %v1953_v5 = vmul.f32 %v1258_v40, %v3913_v3  ;;  %v1733_v15 = vsel %vm1732_vm8, %v2384_v53, %v1729_v7  ;;  %v1263_v47 = vmul.f32 %v2388_v26, %v1262_v16  ;;  %vm1266_vm9 = vweird.f32 %v2388_v26 }
 0x170   :  { %2048 = vst [vmem:[#allocation2 + $0x188] sm:$0xff] %v1984_v42  ;;  %2393 = vrcp.f32 %v4056_v52  ;;  %v1738_v3 = vsel %vm4033_vm15, %v1737_v34, %v1733_v15  ;;  %v1743_v46 = vmul.f32 %v2390_v48, %v1742_v20  ;;  %vm1746_vm10 = vweird.f32 %v2390_v48  ;;  %vm1267_vm13 = vmor %vm1265_vm1, %vm1266_vm9 }
 0x171   :  { %2017 = vst [vmem:[#allocation2 + $0x90] sm:$0xff] %v1953_v5  ;;  %v1276_v55 = vmul.f32 %v2392_v23, %v4010_v6  ;;  %v1985_v32 = vmul.f32 %v1738_v3, %v3933_v22  ;;  %v1264_v60 = vadd.f32 %v2388_v26, %v1263_v47  ;;  %vm1280_vm11 = vweird.f32 %v4010_v6  ;;  %vm1747_vm14 = vmor %vm1745_vm4, %vm1746_vm10  ;;  %v530_v35 = vpop.f32.mrf.mxu2 }
 0x172   :  { %vm4082_vm12 = vcmp.eq.f32.partialorder %v1284_v11, 8.507059e+37  ;;  %v1744_v38 = vadd.f32 %v2390_v48, %v1743_v46  ;;  %2395 = vpow2.f32 %v4017_v45  ;;  %v2202_v33 = vmul.f32 -1.442695, %v4019_v44 }
 0x173   :  { %v1277_v61 = vsub.f32 1.0, %v1276_v55  ;;  %2049 = vst [vmem:[#allocation2 + $0x190] sm:$0xff] %v1985_v32  ;;  %v1268_v34 = vsel %vm1267_vm13, %v2388_v26, %v1264_v60  ;;  %vm1281_vm15 = vweird.f32 %v2392_v23  ;;  %v1287_v22 = vor.u32 1.1754944e-38, %v1286_v31 }
 0x174   :  { %v4094_v9 = vadd.f32 %v3815_v19, %v4030_v30  ;;  %v1273_v54 = vsel %vm4052_vm6, %v1272_v62, %v1268_v34  ;;  %v1748_v56 = vsel %vm1747_vm14, %v2390_v48, %v1744_v38  ;;  %2397 = vpow2.f32 %v2202_v33  ;;  %v696_v19 = vpop.f32.mrf.mxu3  ;;  %vm1282_vm0 = vmor %vm1280_vm11, %vm1281_vm15  ;;  %v452_v15 = vpop.f32.mrf.mxu0 }
 0x175   :  { %v1278_v43 = vmul.f32 %v2392_v23, %v1277_v61  ;;  %v1954_v49 = vmul.f32 %v1273_v54, %v3944_v28  ;;  %v1753_v37 = vsel %vm4061_vm7, %v1752_v12, %v1748_v56  ;;  %v526_v51 = vadd.f32 %v4027_v39, %v4012_v10 }
 0x176   :  { %v2394_v45 = vpop.eup %2393  ;;  %v2171_v26 = vmul.f32 -1.442695, %v4094_v9  ;;  %v1986_v30 = vmul.f32 %v1753_v37, %v3946_v14  ;;  %v1764_v48 = vand.u32 2147483647, %v4056_v52  ;;  %v448_v58 = vadd.f32 %v4027_v39, %v4041_v57  ;;  %v4124_v57 = vpop.f32.mrf.mxu1 }
 0x177   :  { %v1279_v2 = vadd.f32 %v2392_v23, %v1278_v43  ;;  %v1756_v62 = vmul.f32 %v2394_v45, %v4056_v52  ;;  %2018 = vst [vmem:[#allocation2 + $0x98] sm:$0xff] %v1954_v49  ;;  %v4110_v28 = vadd.f32 %v694_v18, %v526_v51  ;;  %v528_v10 = vadd.f32 %v4027_v39, %v527_v0 }
 0x178   :  { %2399 = vpow2.f32 %v2171_v26  ;;  %v2396_v13 = vpop.eup %2395  ;;  %2050 = vst [vmem:[#allocation2 + $0x198] sm:$0xff] %v1986_v30  ;;  %vm1761_vm1 = vweird.f32 %v2394_v45  ;;  %v1766_v27 = vand.u32 2147483648, %v4056_v52  ;;  %v4122_v11 = vadd.f32 %v3874_v17, %v448_v58 }
 0x179   :  { %v1283_v14 = vsel %vm1282_vm0, %v2392_v23, %v1279_v2  ;;  %v1757_v4 = vsub.f32 1.0, %v1756_v62  ;;  %v4118_v25 = vadd.f32 1.0, %v2396_v13  ;;  %v2203_v18 = vmul.f32 -1.442695, %v4110_v28 }
 0x17a   :  { %v1288_v6 = vsel %vm4082_vm12, %v1287_v22, %v1283_v14  ;;  %v2398_v42 = vpop.eup %2397  ;;  %v4127_v16 = vadd.f32 %v696_v19, %v528_v10  ;;  %v451_v5 = vadd.f32 %v4027_v39, %v450_v41  ;;  %vm1760_vm2 = vweird.f32 %v4056_v52  ;;  %v532_v19 = vpop.f32.mrf.mxu2 }
 0x17b   :  { %v1955_v40 = vmul.f32 %v1288_v6, %v3957_v36  ;;  %v1758_v7 = vmul.f32 %v2394_v45, %v1757_v4  ;;  %2401 = vrcp.f32 %v4118_v25  ;;  %v531_v20 = vadd.f32 %v4027_v39, %v530_v35  ;;  %vm1762_vm3 = vmor %vm1760_vm2, %vm1761_vm1 }
 0x17c   :  { %v4133_v17 = vadd.f32 1.0, %v2398_v42  ;;  %2403 = vpow2.f32 %v2203_v18  ;;  %v2172_v31 = vmul.f32 -1.442695, %v4122_v11  ;;  %vm1765_vm4 = vcmp.eq.f32.partialorder %v1764_v48, 8.507059e+37  ;;  %v699_v60 = vpop.f32.mrf.mxu3  ;;  %v455_v6 = vpop.f32.mrf.mxu0 }
 0x17d   :  { %2019 = vst [vmem:[#allocation2 + $0xa0] sm:$0xff] %v1955_v40  ;;  %v1759_v12 = vadd.f32 %v2394_v45, %v1758_v7  ;;  %v1767_v36 = vor.u32 1.1754944e-38, %v1766_v27  ;;  %v2204_v23 = vmul.f32 -1.442695, %v4127_v16  ;;  %v1299_v47 = vand.u32 2147483647, %v4118_v25 }
 0x17e   :  { %v2400_v0 = vpop.eup %2399  ;;  %2405 = vrcp.f32 %v4133_v17  ;;  %v4141_v3 = vadd.f32 %v3927_v1, %v451_v5  ;;  %v1301_v55 = vand.u32 2147483648, %v4118_v25  ;;  %v4147_v38 = vadd.f32 %v699_v60, %v531_v20 }
 0x17f   :  { %v1763_v52 = vsel %vm1762_vm3, %v2394_v45, %v1759_v12  ;;  %v4144_v32 = vadd.f32 1.0, %v2400_v0  ;;  %2407 = vpow2.f32 %v2172_v31  ;;  %v1779_v33 = vand.u32 2147483647, %v4133_v17  ;;  %v4162_v45 = vpop.f32.mrf.mxu1 }
 0x180   :  { %v1768_v46 = vsel %vm1765_vm4, %v1767_v36, %v1763_v52  ;;  %2409 = vpow2.f32 %v2204_v23  ;;  %v1781_v34 = vand.u32 2147483648, %v4133_v17  ;;  %vm1295_vm5 = vweird.f32 %v4118_v25 }
 0x181   :  { %v1987_v53 = vmul.f32 %v1768_v46, %v3964_v59  ;;  %v2402_v61 = vpop.eup %2401  ;;  %2411 = vrcp.f32 %v4144_v32  ;;  %v2173_v41 = vmul.f32 -1.442695, %v4141_v3  ;;  %vm4155_vm6 = vcmp.eq.f32.partialorder %v1299_v47, 8.507059e+37 }
 0x182   :  { %v2404_v1 = vpop.eup %2403  ;;  %v1291_v22 = vmul.f32 %v2402_v61, %v4118_v25  ;;  %v1302_v54 = vor.u32 1.1754944e-38, %v1301_v55  ;;  %v2205_v43 = vmul.f32 -1.442695, %v4147_v38  ;;  %vm1775_vm7 = vweird.f32 %v4133_v17 }
 0x183   :  { %2051 = vst [vmem:[#allocation2 + $0x1a0] sm:$0xff] %v1987_v53  ;;  %v4159_v56 = vadd.f32 1.0, %v2404_v1  ;;  %v1314_v26 = vand.u32 2147483647, %v4144_v32  ;;  %v1316_v51 = vand.u32 2147483648, %v4144_v32  ;;  %vm4168_vm8 = vcmp.eq.f32.partialorder %v1779_v33, 8.507059e+37 }
 0x184   :  { %v2406_v49 = vpop.eup %2405  ;;  %v1292_v37 = vsub.f32 1.0, %v1291_v22  ;;  %v1782_v48 = vor.u32 1.1754944e-38, %v1781_v34  ;;  %vm1296_vm9 = vweird.f32 %v2402_v61  ;;  %vm1310_vm10 = vweird.f32 %v4144_v32  ;;  %v4190_v36 = vpop.f32.mrf.mxu3 }
 0x185   :  { %v2408_v30 = vpop.eup %2407  ;;  %v1771_v2 = vmul.f32 %v2406_v49, %v4133_v17  ;;  %2413 = vrcp.f32 %v4159_v56  ;;  %v453_v35 = vadd.f32 %v4027_v39, %v452_v15  ;;  %vm1776_vm11 = vweird.f32 %v2406_v49  ;;  %vm1297_vm13 = vmor %vm1295_vm5, %vm1296_vm9 }
 0x186   :  { %v2410_v58 = vpop.eup %2409  ;;  %v1293_v10 = vmul.f32 %v2402_v61, %v1292_v37  ;;  %v4174_v13 = vadd.f32 1.0, %v2408_v30  ;;  %2415 = vpow2.f32 %v2173_v41  ;;  %vm4180_vm12 = vcmp.eq.f32.partialorder %v1314_v26, 8.507059e+37  ;;  %vm1777_vm15 = vmor %vm1775_vm7, %vm1776_vm11 }
 0x187   :  { %v2412_v14 = vpop.eup %2411  ;;  %v1772_v4 = vsub.f32 1.0, %v1771_v2  ;;  %v4176_v27 = vadd.f32 1.0, %v2410_v58  ;;  %2417 = vpow2.f32 %v2205_v43  ;;  %v1317_v7 = vor.u32 1.1754944e-38, %v1316_v51  ;;  %v4214_v41 = vpop.f32.mrf.mxu1 }
 0x188   :  { %v1294_v18 = vadd.f32 %v2402_v61, %v1293_v10  ;;  %v1306_v42 = vmul.f32 %v2412_v14, %v4144_v32  ;;  %v1794_v20 = vand.u32 2147483647, %v4159_v56  ;;  %v1796_v12 = vand.u32 2147483648, %v4159_v56  ;;  %v457_v58 = vpop.f32.mrf.mxu0 }
 0x189   :  { %v1773_v5 = vmul.f32 %v2406_v49, %v1772_v4  ;;  %2419 = vrcp.f32 %v4174_v13  ;;  %v4193_v23 = vadd.f32 %v4027_v39, %v532_v19  ;;  %v4196_v15 = vadd.f32 %v4027_v39, %v455_v6 }
 0x18a   :  { %v1298_v31 = vsel %vm1297_vm13, %v2402_v61, %v1294_v18  ;;  %v1307_v0 = vsub.f32 1.0, %v1306_v42  ;;  %vm1790_vm14 = vweird.f32 %v4159_v56  ;;  %2421 = vrcp.f32 %v4176_v27 }
 0x18b   :  { %v2414_v52 = vpop.eup %2413  ;;  %v1303_v25 = vsel %vm4155_vm6, %v1302_v54, %v1298_v31  ;;  %v1774_v47 = vadd.f32 %v2406_v49, %v1773_v5  ;;  %vm1311_vm0 = vweird.f32 %v2412_v14  ;;  %vm4207_vm1 = vcmp.eq.f32.partialorder %v1794_v20, 8.507059e+37  ;;  %v4220_v43 = vpop.f32.mrf.mxu2 }
 0x18c   :  { %v2416_v46 = vpop.eup %2415  ;;  %v1956_v55 = vmul.f32 %v1303_v25, %v3992_v24  ;;  %v1308_v60 = vmul.f32 %v2412_v14, %v1307_v0  ;;  %v1786_v53 = vmul.f32 %v2414_v52, %v4159_v56  ;;  %v1797_v1 = vor.u32 1.1754944e-38, %v1796_v12  ;;  %vm1312_vm3 = vmor %vm1310_vm10, %vm1311_vm0 }
 0x18d   :  { %v2418_v61 = vpop.eup %2417  ;;  %v1778_v33 = vsel %vm1777_vm15, %v2406_v49, %v1774_v47  ;;  %v4212_v22 = vadd.f32 %v3971_v29, %v453_v35  ;;  %vm1325_vm2 = vweird.f32 %v4174_v13  ;;  %v1329_v54 = vand.u32 2147483647, %v4174_v13 }
 0x18e   :  { %2020 = vst [vmem:[#allocation2 + $0xa8] sm:$0xff] %v1956_v55  ;;  %v1783_v24 = vsel %vm4168_vm8, %v1782_v48, %v1778_v33  ;;  %v1309_v17 = vadd.f32 %v2412_v14, %v1308_v60  ;;  %v1787_v59 = vsub.f32 1.0, %v1786_v53  ;;  %v1331_v29 = vand.u32 2147483648, %v4174_v13 }
 0x18f   :  { %v2420_v49 = vpop.eup %2419  ;;  %v1988_v37 = vmul.f32 %v1783_v24, %v4019_v44  ;;  %v4227_v26 = vadd.f32 1.0, %v2416_v46  ;;  %v4229_v51 = vadd.f32 1.0, %v2418_v61  ;;  %vm1791_vm4 = vweird.f32 %v2414_v52  ;;  %v4269_v60 = vpop.f32.mrf.mxu1 }
 0x190   :  { %v1313_v19 = vsel %vm1312_vm3, %v2412_v14, %v1309_v17  ;;  %v1788_v30 = vmul.f32 %v2414_v52, %v1787_v59  ;;  %v1321_v2 = vmul.f32 %v2420_v49, %v4174_v13  ;;  %v2422_v62 = vpop.eup %2421  ;;  %v1809_v48 = vand.u32 2147483647, %v4176_v27  ;;  %vm1792_vm5 = vmor %vm1790_vm14, %vm1791_vm4 }
 0x191   :  { %2052 = vst [vmem:[#allocation2 + $0x1a8] sm:$0xff] %v1988_v37  ;;  %v1318_v44 = vsel %vm4180_vm12, %v1317_v7, %v1313_v19  ;;  %v1811_v32 = vand.u32 2147483648, %v4176_v27  ;;  %2423 = vrcp.f32 %v4227_v26  ;;  %v1801_v35 = vmul.f32 %v2422_v62, %v4176_v27  ;;  %v704_v7 = vpop.f32.mrf.mxu3 }
 0x192   :  { %v1957_v10 = vmul.f32 %v1318_v44, %v4094_v9  ;;  %v1789_v4 = vadd.f32 %v2414_v52, %v1788_v30  ;;  %v1322_v14 = vsub.f32 1.0, %v1321_v2  ;;  %vm1326_vm6 = vweird.f32 %v2420_v49 }
 0x193   :  { %vm4241_vm7 = vcmp.eq.f32.partialorder %v1329_v54, 8.507059e+37  ;;  %vm1805_vm8 = vweird.f32 %v4176_v27  ;;  %2425 = vrcp.f32 %v4229_v51  ;;  %v1802_v9 = vsub.f32 1.0, %v1801_v35  ;;  %vm1327_vm12 = vmor %vm1325_vm2, %vm1326_vm6  ;;  %v537_v34 = vpop.f32.mrf.mxu2  ;;  %v460_v27 = vpop.f32.mrf.mxu0 }
 0x194   :  { %2021 = vst [vmem:[#allocation2 + $0xb0] sm:$0xff] %v1957_v10  ;;  %v1793_v18 = vsel %vm1792_vm5, %v2414_v52, %v1789_v4  ;;  %v1323_v42 = vmul.f32 %v2420_v49, %v1322_v14  ;;  %v1344_v40 = vand.u32 2147483647, %v4227_v26  ;;  %v1332_v5 = vor.u32 1.1754944e-38, %v1331_v29 }
 0x195   :  { %v1798_v56 = vsel %vm4207_vm1, %v1797_v1, %v1793_v18  ;;  %vm4250_vm9 = vcmp.eq.f32.partialorder %v1809_v48, 8.507059e+37  ;;  %v1812_v12 = vor.u32 1.1754944e-38, %v1811_v32  ;;  %v1803_v25 = vmul.f32 %v2422_v62, %v1802_v9 }
 0x196   :  { %v1989_v31 = vmul.f32 %v1798_v56, %v4110_v28  ;;  %v1324_v0 = vadd.f32 %v2420_v49, %v1323_v42  ;;  %vm1806_vm10 = vweird.f32 %v2422_v62  ;;  %vm1340_vm11 = vweird.f32 %v4227_v26 }
 0x197   :  { %v2424_v52 = vpop.eup %2423  ;;  %v1346_v47 = vand.u32 2147483648, %v4227_v26  ;;  %v2174_v46 = vmul.f32 -1.442695, %v4212_v22  ;;  %v4263_v55 = vadd.f32 %v4190_v36, %v4193_v23  ;;  %v4267_v28 = vadd.f32 %v4021_v50, %v4196_v15  ;;  %vm1807_vm15 = vmor %vm1805_vm8, %vm1806_vm10 }
 0x198   :  { %2053 = vst [vmem:[#allocation2 + $0x1b0] sm:$0xff] %v1989_v31  ;;  %v1328_v53 = vsel %vm1327_vm12, %v2420_v49, %v1324_v0  ;;  %v1804_v61 = vadd.f32 %v2422_v62, %v1803_v25  ;;  %v1336_v13 = vmul.f32 %v2424_v52, %v4227_v26  ;;  %vm4272_vm13 = vcmp.eq.f32.partialorder %v1344_v40, 8.507059e+37 }
 0x199   :  { %vm1820_vm14 = vweird.f32 %v4229_v51  ;;  %v2426_v36 = vpop.eup %2425  ;;  %v1333_v23 = vsel %vm4241_vm7, %v1332_v5, %v1328_v53  ;;  %v1824_v50 = vand.u32 2147483647, %v4229_v51  ;;  %2427 = vpow2.f32 %v2174_v46  ;;  %v706_v10 = vpop.f32.mrf.mxu3 }
 0x19a   :  { %v2206_v15 = vmul.f32 -1.442695, %v4263_v55  ;;  %v1958_v1 = vmul.f32 %v1333_v23, %v4122_v11  ;;  %v1808_v24 = vsel %vm1807_vm15, %v2422_v62, %v1804_v61  ;;  %v1337_v17 = vsub.f32 1.0, %v1336_v13 }
 0x19b   :  { %v1816_v59 = vmul.f32 %v2426_v36, %v4229_v51  ;;  %v1813_v54 = vsel %vm4250_vm9, %v1812_v12, %v1808_v24  ;;  %vm1341_vm0 = vweird.f32 %v2424_v52  ;;  %v2175_v49 = vmul.f32 -1.442695, %v4267_v28  ;;  %v540_v20 = vpop.f32.mrf.mxu2  ;;  %v462_v46 = vpop.f32.mrf.mxu0 }
 0x19c   :  { %2429 = vpow2.f32 %v2206_v15  ;;  %2022 = vst [vmem:[#allocation2 + $0xb8] sm:$0xff] %v1958_v1  ;;  %v1990_v37 = vmul.f32 %v1813_v54, %v4127_v16  ;;  %v1338_v29 = vmul.f32 %v2424_v52, %v1337_v17  ;;  %v536_v11 = vadd.f32 %v4027_v39, %v4220_v43  ;;  %vm1342_vm2 = vmor %vm1340_vm11, %vm1341_vm0 }
 0x19d   :  { %v1817_v19 = vsub.f32 1.0, %v1816_v59  ;;  %v1826_v30 = vand.u32 2147483648, %v4229_v51  ;;  %2431 = vpow2.f32 %v2175_v49  ;;  %v458_v2 = vadd.f32 %v4027_v39, %v457_v58 }
 0x19e   :  { %v538_v62 = vadd.f32 %v4027_v39, %v537_v34  ;;  %2054 = vst [vmem:[#allocation2 + $0x1b8] sm:$0xff] %v1990_v37  ;;  %v1339_v44 = vadd.f32 %v2424_v52, %v1338_v29  ;;  %vm1821_vm1 = vweird.f32 %v2426_v36  ;;  %v4295_v32 = vadd.f32 %v704_v7, %v536_v11  ;;  %v639_v7 = vpop.f32.mrf.mxu1 }
 0x19f   :  { %v1818_v48 = vmul.f32 %v2426_v36, %v1817_v19  ;;  %v2428_v16 = vpop.eup %2427  ;;  %v1347_v43 = vor.u32 1.1754944e-38, %v1346_v47  ;;  %v4301_v4 = vadd.f32 %v4075_v63, %v458_v2  ;;  %v461_v58 = vadd.f32 %v4027_v39, %v460_v27  ;;  %vm1822_vm3 = vmor %vm1820_vm14, %vm1821_vm1 }
 0x1a0   :  { %v4303_v14 = vadd.f32 %v706_v10, %v538_v62  ;;  %v1343_v35 = vsel %vm1342_vm2, %v2424_v52, %v1339_v44  ;;  %v4306_v18 = vadd.f32 1.0, %v2428_v16  ;;  %v2207_v42 = vmul.f32 -1.442695, %v4295_v32 }
 0x1a1   :  { %v1819_v6 = vadd.f32 %v2426_v36, %v1818_v48  ;;  %v471_v40 = vadd.f32 %v4027_v39, %v2837_v8  ;;  %v1348_v26 = vsel %vm4272_vm13, %v1347_v43, %v1343_v35  ;;  %v1827_v63 = vor.u32 1.1754944e-38, %v1826_v30 }
 0x1a2   :  { %v2430_v9 = vpop.eup %2429  ;;  %v1959_v56 = vmul.f32 %v1348_v26, %v4141_v3  ;;  %vm1825_vm4 = vcmp.eq.f32.partialorder %v1824_v50, 8.507059e+37  ;;  %2433 = vrcp.f32 %v4306_v18  ;;  %v2176_v8 = vmul.f32 -1.442695, %v4301_v4  ;;  %v709_v50 = vpop.f32.mrf.mxu3 }
 0x1a3   :  { %v1823_v5 = vsel %vm1822_vm3, %v2426_v36, %v1819_v6  ;;  %v2432_v12 = vpop.eup %2431  ;;  %v4318_v0 = vadd.f32 1.0, %v2430_v9  ;;  %v4322_v25 = vadd.f32 %v4124_v57, %v461_v58  ;;  %2435 = vpow2.f32 %v2207_v42 }
 0x1a4   :  { %v1828_v31 = vsel %vm1825_vm4, %v1827_v63, %v1823_v5  ;;  %2023 = vst [vmem:[#allocation2 + $0xc0] sm:$0xff] %v1959_v56  ;;  %v4325_v52 = vadd.f32 1.0, %v2432_v12  ;;  %v2208_v3 = vmul.f32 -1.442695, %v4303_v14  ;;  %v541_v47 = vadd.f32 %v4027_v39, %v540_v20 }
 0x1a5   :  { %v1991_v51 = vmul.f32 %v1828_v31, %v4147_v38  ;;  %2437 = vrcp.f32 %v4318_v0  ;;  %v1359_v53 = vand.u32 2147483647, %v4306_v18  ;;  %v1361_v61 = vand.u32 2147483648, %v4306_v18 }
 0x1a6   :  { %2439 = vrcp.f32 %v4325_v52  ;;  %v4333_v57 = vadd.f32 %v639_v7, %v471_v40  ;;  %v473_v38 = vadd.f32 %v4027_v39, %v2858_v21  ;;  %v1841_v13 = vand.u32 2147483648, %v4318_v0  ;;  %v641_v11 = vpop.f32.mrf.mxu1  ;;  %v542_v7 = vpop.f32.mrf.mxu2 }
 0x1a7   :  { %2055 = vst [vmem:[#allocation2 + $0x1c0] sm:$0xff] %v1991_v51  ;;  %2441 = vpow2.f32 %v2176_v8  ;;  %v2177_v33 = vmul.f32 -1.442695, %v4322_v25  ;;  %v1839_v36 = vand.u32 2147483647, %v4318_v0  ;;  %v1376_v23 = vand.u32 2147483648, %v4325_v52 }
 0x1a8   :  { %v2434_v34 = vpop.eup %2433  ;;  %2443 = vpow2.f32 %v2208_v3  ;;  %v463_v15 = vadd.f32 %v4027_v39, %v462_v46  ;;  %vm1355_vm5 = vweird.f32 %v4306_v18  ;;  %v1374_v21 = vand.u32 2147483647, %v4325_v52 }
 0x1a9   :  { %v1351_v1 = vmul.f32 %v2434_v34, %v4306_v18  ;;  %v4345_v24 = vadd.f32 %v709_v50, %v541_v47  ;;  %v2436_v17 = vpop.eup %2435  ;;  %vm4347_vm6 = vcmp.eq.f32.partialorder %v1359_v53, 8.507059e+37  ;;  %v1362_v54 = vor.u32 1.1754944e-38, %v1361_v61 }
 0x1aa   :  { %vm1835_vm7 = vweird.f32 %v4318_v0  ;;  %v2181_v49 = vmul.f32 -1.442695, %v4333_v57  ;;  %vm1356_vm8 = vweird.f32 %v2434_v34  ;;  %v1842_v29 = vor.u32 1.1754944e-38, %v1841_v13 }
 0x1ab   :  { %v2438_v27 = vpop.eup %2437  ;;  %v1352_v37 = vsub.f32 1.0, %v1351_v1  ;;  %vm1370_vm9 = vweird.f32 %v4325_v52  ;;  %v4354_v19 = vadd.f32 1.0, %v2436_v17  ;;  %vm4357_vm10 = vcmp.eq.f32.partialorder %v1839_v36, 8.507059e+37  ;;  %vm1357_vm13 = vmor %vm1355_vm5, %vm1356_vm8 }
 0x1ac   :  { %v2440_v30 = vpop.eup %2439  ;;  %v1831_v2 = vmul.f32 %v2438_v27, %v4318_v0  ;;  %v1377_v44 = vor.u32 1.1754944e-38, %v1376_v23  ;;  %2445 = vpow2.f32 %v2177_v33  ;;  %v4362_v48 = vadd.f32 %v4162_v45, %v463_v15 }
 0x1ad   :  { %v2442_v10 = vpop.eup %2441  ;;  %v1353_v16 = vmul.f32 %v2434_v34, %v1352_v37  ;;  %v1366_v43 = vmul.f32 %v2440_v30, %v4325_v52  ;;  %vm4365_vm11 = vcmp.eq.f32.partialorder %v1374_v21, 8.507059e+37  ;;  %2447 = vrcp.f32 %v4354_v19 }
 0x1ae   :  { %v2209_v35 = vmul.f32 -1.442695, %v4345_v24  ;;  %v2444_v6 = vpop.eup %2443  ;;  %v1832_v42 = vsub.f32 1.0, %v1831_v2  ;;  %vm1836_vm12 = vweird.f32 %v2438_v27  ;;  %2449 = vpow2.f32 %v2181_v49 }
 0x1af   :  { %v4371_v9 = vadd.f32 %v641_v11, %v473_v38  ;;  %v1354_v45 = vadd.f32 %v2434_v34, %v1353_v16  ;;  %v1367_v40 = vsub.f32 1.0, %v1366_v43  ;;  %v4373_v26 = vadd.f32 1.0, %v2442_v10  ;;  %vm1837_vm15 = vmor %vm1835_vm7, %vm1836_vm12 }
 0x1b0   :  { %v4375_v63 = vadd.f32 1.0, %v2444_v6  ;;  %v1833_v56 = vmul.f32 %v2438_v27, %v1832_v42  ;;  %vm1371_vm14 = vweird.f32 %v2440_v30  ;;  %v1854_v5 = vand.u32 2147483647, %v4354_v19 }
 0x1b1   :  { %v2178_v20 = vmul.f32 -1.442695, %v4362_v48  ;;  %v1358_v12 = vsel %vm1357_vm13, %v2434_v34, %v1354_v45  ;;  %v1368_v31 = vmul.f32 %v2440_v30, %v1367_v40  ;;  %v1856_v8 = vand.u32 2147483648, %v4354_v19  ;;  %vm1372_vm1 = vmor %vm1370_vm9, %vm1371_vm14 }
 0x1b2   :  { %2451 = vrcp.f32 %v4373_v26  ;;  %v2446_v51 = vpop.eup %2445  ;;  %v1363_v3 = vsel %vm4347_vm6, %v1362_v54, %v1358_v12  ;;  %v1834_v47 = vadd.f32 %v2438_v27, %v1833_v56  ;;  %v4387_v18 = vadd.f32 %v4027_v39, %v542_v7 }
 0x1b3   :  { %2453 = vpow2.f32 %v2209_v35  ;;  %v2448_v46 = vpop.eup %2447  ;;  %v1960_v53 = vmul.f32 %v1363_v3, %v4212_v22  ;;  %v1369_v61 = vadd.f32 %v2440_v30, %v1368_v31  ;;  %vm1850_vm0 = vweird.f32 %v4354_v19  ;;  %v465_v31 = vpop.f32.mrf.mxu0 }
 0x1b4   :  { %2455 = vrcp.f32 %v4375_v63  ;;  %v2450_v38 = vpop.eup %2449  ;;  %v1838_v13 = vsel %vm1837_vm15, %v2438_v27, %v1834_v47  ;;  %v1846_v33 = vmul.f32 %v2448_v46, %v4354_v19  ;;  %vm4399_vm2 = vcmp.eq.f32.partialorder %v1854_v5, 8.507059e+37 }
 0x1b5   :  { %2457 = vpow2.f32 %v2178_v20  ;;  %2024 = vst [vmem:[#allocation2 + $0xc8] sm:$0xff] %v1960_v53  ;;  %v1843_v22 = vsel %vm4357_vm10, %v1842_v29, %v1838_v13  ;;  %v1373_v0 = vsel %vm1372_vm1, %v2440_v30, %v1369_v61  ;;  %v1857_v36 = vor.u32 1.1754944e-38, %v1856_v8  ;;  %v711_v30 = vpop.f32.mrf.mxu3 }
 0x1b6   :  { %v1389_v23 = vand.u32 2147483647, %v4373_v26  ;;  %v1992_v50 = vmul.f32 %v1843_v22, %v4263_v55  ;;  %v1378_v52 = vsel %vm4365_vm11, %v1377_v44, %v1373_v0  ;;  %v1847_v15 = vsub.f32 1.0, %v1846_v33 }
 0x1b7   :  { %v1391_v1 = vand.u32 2147483648, %v4373_v26  ;;  %v1961_v17 = vmul.f32 %v1378_v52, %v4267_v28  ;;  %v1869_v59 = vand.u32 2147483647, %v4375_v63  ;;  %v4412_v54 = vadd.f32 1.0, %v2446_v51 }
 0x1b8   :  { %v2452_v21 = vpop.eup %2451  ;;  %v4414_v49 = vadd.f32 1.0, %v2450_v38  ;;  %2056 = vst [vmem:[#allocation2 + $0x1c8] sm:$0xff] %v1992_v50  ;;  %v1848_v37 = vmul.f32 %v2448_v46, %v1847_v15  ;;  %vm1851_vm3 = vweird.f32 %v2448_v46  ;;  %vm1385_vm4 = vweird.f32 %v4373_v26 }
 0x1b9   :  { %v2454_v27 = vpop.eup %2453  ;;  %v1381_v55 = vmul.f32 %v2452_v21, %v4373_v26  ;;  %2025 = vst [vmem:[#allocation2 + $0xd0] sm:$0xff] %v1961_v17  ;;  %vm4418_vm5 = vcmp.eq.f32.partialorder %v1389_v23, 8.507059e+37  ;;  %vm1865_vm6 = vweird.f32 %v4375_v63  ;;  %v1871_v28 = vand.u32 2147483648, %v4375_v63  ;;  %vm1852_vm7 = vmor %vm1850_vm0, %vm1851_vm3 }
 0x1ba   :  { %v2456_v29 = vpop.eup %2455  ;;  %2459 = vrcp.f32 %v4412_v54  ;;  %v1849_v62 = vadd.f32 %v2448_v46, %v1848_v37  ;;  %v1392_v10 = vor.u32 1.1754944e-38, %v1391_v1  ;;  %vm1386_vm8 = vweird.f32 %v2452_v21 }
 0x1bb   :  { %v2458_v2 = vpop.eup %2457  ;;  %v1382_v44 = vsub.f32 1.0, %v1381_v55  ;;  %v1861_v16 = vmul.f32 %v2456_v29, %v4375_v63  ;;  %vm4429_vm9 = vcmp.eq.f32.partialorder %v1869_v59, 8.507059e+37  ;;  %v1406_v58 = vand.u32 2147483648, %v4412_v54  ;;  %vm1387_vm12 = vmor %vm1385_vm4, %vm1386_vm8  ;;  %v467_v43 = vpop.f32.mrf.mxu0 }
 0x1bc   :  { %2461 = vrcp.f32 %v4414_v49  ;;  %v1853_v35 = vsel %vm1852_vm7, %v2448_v46, %v1849_v62  ;;  %v1404_v45 = vand.u32 2147483647, %v4412_v54  ;;  %v1872_v7 = vor.u32 1.1754944e-38, %v1871_v28  ;;  %v4450_v46 = vpop.f32.mrf.mxu2 }
 0x1bd   :  { %v1383_v6 = vmul.f32 %v2452_v21, %v1382_v44  ;;  %v1862_v42 = vsub.f32 1.0, %v1861_v16  ;;  %v1858_v40 = vsel %vm4399_vm2, %v1857_v36, %v1853_v35  ;;  %v4438_v19 = vadd.f32 1.0, %v2454_v27  ;;  %v714_v15 = vpop.f32.mrf.mxu3 }
 0x1be   :  { %v4440_v56 = vadd.f32 1.0, %v2458_v2  ;;  %v1993_v5 = vmul.f32 %v1858_v40, %v4295_v32  ;;  %vm1866_vm10 = vweird.f32 %v2456_v29  ;;  %vm1400_vm11 = vweird.f32 %v4412_v54 }
 0x1bf   :  { %v1384_v20 = vadd.f32 %v2452_v21, %v1383_v6  ;;  %v1863_v12 = vmul.f32 %v2456_v29, %v1862_v42  ;;  %v1407_v51 = vor.u32 1.1754944e-38, %v1406_v58  ;;  %v1464_v3 = vand.u32 2147483647, %v4414_v49  ;;  %vm1867_vm15 = vmor %vm1865_vm6, %vm1866_vm10 }
 0x1c0   :  { %v2460_v8 = vpop.eup %2459  ;;  %v1466_v47 = vand.u32 2147483648, %v4414_v49  ;;  %2463 = vrcp.f32 %v4438_v19  ;;  %2057 = vst [vmem:[#allocation2 + $0x1d0] sm:$0xff] %v1993_v5  ;;  %vm4453_vm13 = vcmp.eq.f32.partialorder %v1404_v45, 8.507059e+37  ;;  %vm1460_vm14 = vweird.f32 %v4414_v49 }
 0x1c1   :  { %v1388_v32 = vsel %vm1387_vm12, %v2452_v21, %v1384_v20  ;;  %v1864_v53 = vadd.f32 %v2456_v29, %v1863_v12  ;;  %v1396_v61 = vmul.f32 %v2460_v8, %v4412_v54  ;;  %v1884_v33 = vand.u32 2147483647, %v4438_v19 }
 0x1c2   :  { %v2462_v26 = vpop.eup %2461  ;;  %v1393_v13 = vsel %vm4418_vm5, %v1392_v10, %v1388_v32  ;;  %v1886_v34 = vand.u32 2147483648, %v4438_v19  ;;  %2465 = vrcp.f32 %v4440_v56  ;;  %vm1401_vm0 = vweird.f32 %v2460_v8 }
 0x1c3   :  { %v1962_v22 = vmul.f32 %v1393_v13, %v4301_v4  ;;  %v1868_v0 = vsel %vm1867_vm15, %v2456_v29, %v1864_v53  ;;  %v1397_v36 = vsub.f32 1.0, %v1396_v61  ;;  %v1456_v23 = vmul.f32 %v2462_v26, %v4414_v49  ;;  %vm1402_vm5 = vmor %vm1400_vm11, %vm1401_vm0  ;;  %v2493_v49 = vld [vmem:[%s4568_s2] ss:$0 sm:$0xff]  ;;  %s2520_s2 = smov [#allocation2]  }
 0x1c4   :  { %v1873_v50 = vsel %vm4429_vm9, %v1872_v7, %v1868_v0  ;;  %vm4470_vm1 = vcmp.eq.f32.partialorder %v1464_v3, 8.507059e+37  ;;  %v1467_v63 = vor.u32 1.1754944e-38, %v1466_v47  ;;  %vm1461_vm2 = vweird.f32 %v2462_v26  ;;  %v547_v35 = vpop.f32.mrf.mxu2  ;;  %s2067_s14 = sshll.u32 %s2520_s2, 4  ;;  %s2068_s14 = int_to_ptr.vmem [resolvable:$true] %s2067_s14 }
 0x1c5   :  { %2026 = vst [vmem:[#allocation2 + $0xd8] sm:$0xff] %v1962_v22  ;;  %v1994_v1 = vmul.f32 %v1873_v50, %v4303_v14  ;;  %v1398_v21 = vmul.f32 %v2460_v8, %v1397_v36  ;;  %v1457_v17 = vsub.f32 1.0, %v1456_v23  ;;  %vm1880_vm3 = vweird.f32 %v4438_v19  ;;  %vm1462_vm7 = vmor %vm1460_vm14, %vm1461_vm2 }
 0x1c6   :  { %v2464_v4 = vpop.eup %2463  ;;  %v1887_v59 = vor.u32 1.1754944e-38, %v1886_v34  ;;  %v2182_v27 = vmul.f32 -1.442695, %v4371_v9  ;;  %v4478_v37 = vadd.f32 %v711_v30, %v4387_v18  ;;  %v466_v55 = vadd.f32 %v4027_v39, %v465_v31 }
 0x1c7   :  { %2058 = vst [vmem:[#allocation2 + $0x1d8] sm:$0xff] %v1994_v1  ;;  %v1399_v29 = vadd.f32 %v2460_v8, %v1398_v21  ;;  %v1458_v11 = vmul.f32 %v2462_v26, %v1457_v17  ;;  %v1876_v28 = vmul.f32 %v2464_v4, %v4438_v19  ;;  %vm4482_vm4 = vcmp.eq.f32.partialorder %v1884_v33, 8.507059e+37 }
 0x1c8   :  { %v1419_v2 = vand.u32 2147483647, %v4440_v56  ;;  %v2466_v62 = vpop.eup %2465  ;;  %vm1881_vm6 = vweird.f32 %v2464_v4  ;;  %v1421_v18 = vand.u32 2147483648, %v4440_v56  ;;  %2467 = vpow2.f32 %v2182_v27 }
 0x1c9   :  { %v2210_v39 = vmul.f32 -1.442695, %v4478_v37  ;;  %v1403_v30 = vsel %vm1402_vm5, %v2460_v8, %v1399_v29  ;;  %v1459_v44 = vadd.f32 %v2462_v26, %v1458_v11  ;;  %v1877_v10 = vsub.f32 1.0, %v1876_v28  ;;  %vm1882_vm9 = vmor %vm1880_vm3, %vm1881_vm6 }
 0x1ca   :  { %v1411_v16 = vmul.f32 %v2466_v62, %v4440_v56  ;;  %v1408_v58 = vsel %vm4453_vm13, %v1407_v51, %v1403_v30  ;;  %vm1416_vm8 = vweird.f32 %v2466_v62  ;;  %v4499_v54 = vadd.f32 %v4214_v41, %v466_v55 }
 0x1cb   :  { %2469 = vpow2.f32 %v2210_v39  ;;  %v1963_v6 = vmul.f32 %v1408_v58, %v4322_v25  ;;  %v1463_v42 = vsel %vm1462_vm7, %v2462_v26, %v1459_v44  ;;  %v1878_v45 = vmul.f32 %v2464_v4, %v1877_v10 }
 0x1cc   :  { %v1412_v40 = vsub.f32 1.0, %v1411_v16  ;;  %v1468_v7 = vsel %vm4470_vm1, %v1467_v63, %v1463_v42  ;;  %v2179_v5 = vmul.f32 -1.442695, %v4499_v54  ;;  %v546_v20 = vadd.f32 %v2493_v49, %v4450_v46  ;;  %v716_v46 = vpop.f32.mrf.mxu3 }
 0x1cd   :  { %v468_v12 = vadd.f32 %v2493_v49, %v467_v43  ;;  %2027 = vst [vmem:[#allocation2 + $0xe0] sm:$0xff] %v1963_v6  ;;  %v1967_v41 = vmul.f32 %v1468_v7, %v4333_v57  ;;  %v1879_v31 = vadd.f32 %v2464_v4, %v1878_v45  ;;  %v548_v8 = vadd.f32 %v2493_v49, %v547_v35 }
 0x1ce   :  { %v1413_v25 = vmul.f32 %v2466_v62, %v1412_v40  ;;  %v2468_v51 = vpop.eup %2467  ;;  %vm1415_vm10 = vweird.f32 %v4440_v56  ;;  %2471 = vpow2.f32 %v2179_v5  ;;  %v4514_v3 = vadd.f32 %v714_v15, %v546_v20 }
 0x1cf   :  { %v4517_v47 = vadd.f32 %v4269_v60, %v468_v12  ;;  %2031 = vst [vmem:[#allocation2 + $0x100] sm:$0xff] %v1967_v41  ;;  %v1883_v32 = vsel %vm1882_vm9, %v2464_v4, %v1879_v31  ;;  %v944_v53 = vadd.f32 1.0, %v2468_v51  ;;  %v4519_v61 = vadd.f32 %v716_v46, %v548_v8  ;;  %vm1417_vm11 = vmor %vm1415_vm10, %vm1416_vm8 }
 0x1d0   :  { %v1414_v57 = vadd.f32 %v2466_v62, %v1413_v25  ;;  %v1888_v19 = vsel %vm4482_vm4, %v1887_v59, %v1883_v32  ;;  %vm1420_vm12 = vcmp.eq.f32.partialorder %v1419_v2, 8.507059e+37  ;;  %v1422_v56 = vor.u32 1.1754944e-38, %v1421_v18 }
 0x1d1   :  { %v2470_v38 = vpop.eup %2469  ;;  %v2211_v26 = vmul.f32 -1.442695, %v4514_v3  ;;  %v1995_v60 = vmul.f32 %v1888_v19, %v4345_v24  ;;  %2473 = vrcp.f32 %v944_v53  ;;  %v2180_v33 = vmul.f32 -1.442695, %v4517_v47 }
 0x1d2   :  { %v1418_v13 = vsel %vm1417_vm11, %v2466_v62, %v1414_v57  ;;  %v972_v22 = vadd.f32 1.0, %v2470_v38  ;;  %v2212_v36 = vmul.f32 -1.442695, %v4519_v61  ;;  %v1479_v21 = vand.u32 2147483647, %v944_v53 }
 0x1d3   :  { %v1423_v34 = vsel %vm1420_vm12, %v1422_v56, %v1418_v13  ;;  %2059 = vst [vmem:[#allocation2 + $0x1e0] sm:$0xff] %v1995_v60  ;;  %2475 = vpow2.f32 %v2211_v26  ;;  %v1481_v17 = vand.u32 2147483648, %v944_v53  ;;  %vm1475_vm13 = vweird.f32 %v944_v53 }
 0x1d4   :  { %v1964_v0 = vmul.f32 %v1423_v34, %v4362_v48  ;;  %v2472_v23 = vpop.eup %2471  ;;  %2477 = vrcp.f32 %v972_v22  ;;  %v1901_v28 = vand.u32 2147483648, %v972_v22  ;;  %vm1480_vm15 = vcmp.eq.f32.partialorder %v1479_v21, 8.507059e+37 }
 0x1d5   :  { %v4529_v50 = vadd.f32 1.0, %v2472_v23  ;;  %2479 = vpow2.f32 %v2180_v33  ;;  %v1482_v18 = vor.u32 1.1754944e-38, %v1481_v17  ;;  %v1899_v44 = vand.u32 2147483647, %v972_v22 }
 0x1d6   :  { %2028 = vst [vmem:[#allocation2 + $0xe8] sm:$0xff] %v1964_v0  ;;  %2481 = vpow2.f32 %v2212_v36  ;;  %vm1895_vm2 = vweird.f32 %v972_v22  ;;  %v1902_v6 = vor.u32 1.1754944e-38, %v1901_v28 }
 0x1d7   :  { %v2474_v24 = vpop.eup %2473  ;;  %2483 = vrcp.f32 %v4529_v50  ;;  %v1436_v43 = vand.u32 2147483648, %v4529_v50  ;;  %v1434_v7 = vand.u32 2147483647, %v4529_v50  ;;  %vm1900_vm5 = vcmp.eq.f32.partialorder %v1899_v44, 8.507059e+37 }
 0x1d8   :  { %v1471_v52 = vmul.f32 %v2474_v24, %v944_v53  ;;  %vm1476_vm14 = vweird.f32 %v2474_v24  ;;  %vm1430_vm6 = vweird.f32 %v4529_v50 }
 0x1d9   :  { %v2476_v63 = vpop.eup %2475  ;;  %vm1477_vm0 = vmor %vm1475_vm13, %vm1476_vm14  ;;  %v1437_v41 = vor.u32 1.1754944e-38, %v1436_v43  ;;  %vm1435_vm8 = vcmp.eq.f32.partialorder %v1434_v7, 8.507059e+37 }
 0x1da   :  { %v2478_v15 = vpop.eup %2477  ;;  %v1472_v1 = vsub.f32 1.0, %v1471_v52  ;;  %v4532_v48 = vadd.f32 1.0, %v2476_v63 }
 0x1db   :  { %v2480_v4 = vpop.eup %2479  ;;  %v1891_v59 = vmul.f32 %v2478_v15, %v972_v22  ;;  %vm1896_vm1 = vweird.f32 %v2478_v15 }
 0x1dc   :  { %v2482_v27 = vpop.eup %2481  ;;  %v1473_v55 = vmul.f32 %v2474_v24, %v1472_v1  ;;  %2485 = vrcp.f32 %v4532_v48  ;;  %v4535_v14 = vadd.f32 1.0, %v2480_v4  ;;  %vm1897_vm3 = vmor %vm1895_vm2, %vm1896_vm1  ;;  %v1914_v8 = vand.u32 2147483647, %v4532_v48 }
 0x1dd   :  { %v2484_v29 = vpop.eup %2483  ;;  %v1892_v11 = vsub.f32 1.0, %v1891_v59  ;;  %v4537_v2 = vadd.f32 1.0, %v2482_v27  ;;  %v1916_v51 = vand.u32 2147483648, %v4532_v48  ;;  %vm1910_vm10 = vweird.f32 %v4532_v48 }
 0x1de   :  { %v1474_v62 = vadd.f32 %v2474_v24, %v1473_v55  ;;  %v1426_v39 = vmul.f32 %v2484_v29, %v4529_v50  ;;  %2487 = vrcp.f32 %v4535_v14  ;;  %vm1431_vm4 = vweird.f32 %v2484_v29 }
 0x1df   :  { %v1893_v30 = vmul.f32 %v2478_v15, %v1892_v11  ;;  %2489 = vrcp.f32 %v4537_v2  ;;  %vm1432_vm7 = vmor %vm1430_vm6, %vm1431_vm4  ;;  %vm1915_vm11 = vcmp.eq.f32.partialorder %v1914_v8, 8.507059e+37  ;;  %v1917_v60 = vor.u32 1.1754944e-38, %v1916_v51 }
 0x1e0   :  { %v1478_v10 = vsel %vm1477_vm0, %v2474_v24, %v1474_v62  ;;  %v1427_v16 = vsub.f32 1.0, %v1426_v39  ;;  %v1451_v13 = vand.u32 2147483648, %v4535_v14  ;;  %v1449_v34 = vand.u32 2147483647, %v4535_v14 }
 0x1e1   :  { %v1483_v58 = vsel %vm1480_vm15, %v1482_v18, %v1478_v10  ;;  %v1894_v35 = vadd.f32 %v2478_v15, %v1893_v30  ;;  %vm1445_vm14 = vweird.f32 %v4535_v14  ;;  %v1931_v36 = vand.u32 2147483648, %v4537_v2 }
 0x1e2   :  { %v2486_v42 = vpop.eup %2485  ;;  %v1968_v45 = vmul.f32 %v1483_v58, %v4371_v9  ;;  %v1428_v40 = vmul.f32 %v2484_v29, %v1427_v16  ;;  %v1452_v63 = vor.u32 1.1754944e-38, %v1451_v13  ;;  %vm1450_vm1 = vcmp.eq.f32.partialorder %v1449_v34, 8.507059e+37 }
 0x1e3   :  { %v1898_v5 = vsel %vm1897_vm3, %v2478_v15, %v1894_v35  ;;  %v1906_v49 = vmul.f32 %v2486_v42, %v4532_v48  ;;  %vm1911_vm9 = vweird.f32 %v2486_v42  ;;  %vm1925_vm2 = vweird.f32 %v4537_v2 }
 0x1e4   :  { %2032 = vst [vmem:[#allocation2 + $0x108] sm:$0xff] %v1968_v45  ;;  %v1903_v20 = vsel %vm1900_vm5, %v1902_v6, %v1898_v5  ;;  %v1429_v12 = vadd.f32 %v2484_v29, %v1428_v40  ;;  %v2488_v31 = vpop.eup %2487  ;;  %vm1912_vm12 = vmor %vm1910_vm10, %vm1911_vm9  ;;  %v1932_v17 = vor.u32 1.1754944e-38, %v1931_v36 }
 0x1e5   :  { %v1996_v25 = vmul.f32 %v1903_v20, %v4478_v37  ;;  %v1907_v9 = vsub.f32 1.0, %v1906_v49  ;;  %v1441_v32 = vmul.f32 %v2488_v31, %v4535_v14  ;;  %v2490_v57 = vpop.eup %2489  ;;  %vm1446_vm13 = vweird.f32 %v2488_v31 }
 0x1e6   :  { %v1433_v46 = vsel %vm1432_vm7, %v2484_v29, %v1429_v12  ;;  %v1921_v56 = vmul.f32 %v2490_v57, %v4537_v2  ;;  %vm1926_vm15 = vweird.f32 %v2490_v57  ;;  %vm1447_vm0 = vmor %vm1445_vm14, %vm1446_vm13 }
 0x1e7   :  { %2060 = vst [vmem:[#allocation2 + $0x1e8] sm:$0xff] %v1996_v25  ;;  %v1438_v53 = vsel %vm1435_vm8, %v1437_v41, %v1433_v46  ;;  %v1908_v38 = vmul.f32 %v2486_v42, %v1907_v9  ;;  %v1442_v37 = vsub.f32 1.0, %v1441_v32  ;;  %vm1927_vm3 = vmor %vm1925_vm2, %vm1926_vm15 }
 0x1e8   :  { %v1965_v19 = vmul.f32 %v1438_v53, %v4499_v54  ;;  %v1922_v22 = vsub.f32 1.0, %v1921_v56  ;;  %v1929_v54 = vand.u32 2147483647, %v4537_v2 }
 0x1e9   :  { %v1909_v26 = vadd.f32 %v2486_v42, %v1908_v38  ;;  %v1443_v33 = vmul.f32 %v2488_v31, %v1442_v37 }
 0x1ea   :  { %2029 = vst [vmem:[#allocation2 + $0xf0] sm:$0xff] %v1965_v19  ;;  %v1923_v24 = vmul.f32 %v2490_v57, %v1922_v22  ;;  %vm1930_vm4 = vcmp.eq.f32.partialorder %v1929_v54, 8.507059e+37 }
 0x1eb   :  { %v1913_v0 = vsel %vm1912_vm12, %v2486_v42, %v1909_v26  ;;  %v1444_v50 = vadd.f32 %v2488_v31, %v1443_v33 }
 0x1ec   :  { %v1918_v23 = vsel %vm1915_vm11, %v1917_v60, %v1913_v0  ;;  %v1924_v1 = vadd.f32 %v2490_v57, %v1923_v24 }
 0x1ed   :  { %v1997_v52 = vmul.f32 %v1918_v23, %v4514_v3  ;;  %v1448_v15 = vsel %vm1447_vm0, %v2488_v31, %v1444_v50 }
 0x1ee   :  { %v1453_v21 = vsel %vm1450_vm1, %v1452_v63, %v1448_v15  ;;  %v1928_v3 = vsel %vm1927_vm3, %v2490_v57, %v1924_v1 }
 0x1ef   :  { %2061 = vst [vmem:[#allocation2 + $0x1f0] sm:$0xff] %v1997_v52  ;;  %v1966_v48 = vmul.f32 %v1453_v21, %v4517_v47  ;;  %v1933_v4 = vsel %vm1930_vm4, %v1932_v17, %v1928_v3 }
 0x1f0   :  { %v1998_v59 = vmul.f32 %v1933_v4, %v4519_v61 }
 0x1f1   :  { %2030 = vst [vmem:[#allocation2 + $0xf8] sm:$0xff] %v1966_v48 }
 0x1f2   :  { %2062 = vst [vmem:[#allocation2 + $0x1f8] sm:$0xff] %v1998_v59 }
 0x1f3   :  { %2075 = dma.vmem_to_hbm [thread:$0]  %s2068_s14, 8192, %s2070_s17, [#allocation3], %s2521_s18, %s2521_s18, %s2522_s19  }
 0x1f4   :  { %2518 = dma.done.wait [#allocation3], 8192  }
 0x1f5   :  { %2519 = vsyncadd [#allocation3], 4294959104 }
 0x1f6   :  { %2080 = vsyncpa [#allocation3], 1 }

</bundles_post_ra>
